<compile_context>
chip_gen: v7x
topology: tpu7x:2x2x1
jax: 0.10.0
libtpu: 0.0.40
codegen_flags: <defaults>
</compile_context>

<pallas_src>
import jax
import jax.numpy as jnp
from jax import lax
from jax.experimental import pallas as pl
from jax.experimental.pallas import tpu as pltpu

_MIB = 1024 * 1024
_ALIGN_M = 16   # row-tile alignment: 8 sublanes (f32) / 16 (bf16 packing)


# --------------------------------------------------------------------------- #
# Kernels
# --------------------------------------------------------------------------- #
def _ffn_kernel_resident(x_ref, w1_ref, b1_ref, w2_ref, b2_ref, o_ref):
    """Whole FFN for one row tile; W1/W2/b1/b2 stay resident in VMEM."""
    h = jnp.dot(x_ref[...], w1_ref[...], preferred_element_type=jnp.float32)
    h = jnp.maximum(h + b1_ref[...], 0.0)       # bias + ReLU epilogue kept in f32
    # TODO(synk): dropout is identity (eval mode); training-mode dropout would
    # draw a keep mask with pltpu.prng_seed / pltpu.prng_random_bits here.
    h = h.astype(w2_ref.dtype)                  # feed the MXU in the weight dtype
    y = jnp.dot(h, w2_ref[...], preferred_element_type=jnp.float32) + b2_ref[...]
    o_ref[...] = y.astype(o_ref.dtype)


def _ffn_kernel_chunked(x_ref, w1_ref, b1_ref, w2_ref, b2_ref, o_ref, *acc):
    """One (row tile, d_ff chunk) step; reduction over the d_ff grid axis.

    `acc` is empty when the output dtype is f32 (accumulate straight into the
    resident output block), else a single f32 VMEM scratch accumulator.
    """
    acc_ref = acc[0] if acc else o_ref
    ff = pl.program_id(1)

    @pl.when(ff == 0)
    def _():  # init the accumulator with the output bias (saves a flush-time add)
        acc_ref[...] = jnp.broadcast_to(b2_ref[...], acc_ref.shape).astype(acc_ref.dtype)

    h = jnp.dot(x_ref[...], w1_ref[...], preferred_element_type=jnp.float32)
    h = jnp.maximum(h + b1_ref[...], 0.0)       # bias + ReLU epilogue kept in f32
    # TODO(synk): dropout is identity (eval mode).
    h = h.astype(w2_ref.dtype)
    acc_ref[...] += jnp.dot(h, w2_ref[...], preferred_element_type=jnp.float32)

    if acc:  # separate f32 accumulator: downcast into the output on the last step
        @pl.when(ff == pl.num_programs(1) - 1)
        def _():
            o_ref[...] = acc_ref[...].astype(o_ref.dtype)


# --------------------------------------------------------------------------- #
# Wrapper
# --------------------------------------------------------------------------- #
def _vmem_capacity_bytes():
    """Physical per-core VMEM, with a conservative fallback (v7x = 64 MiB/TC)."""
    try:
        info = pltpu.get_tpu_info()
        for name in ("vmem_capacity_bytes", "vmem_size_bytes", "vmem_bytes"):
            val = getattr(info, name, None)
            if val:
                return int(val)
    except Exception:
        pass
    return 64 * _MIB


def feed_forward(x, w1, b1, w2, b2, *, tile_m=None, t_ff=None):
    """Fused FFN forward: y = relu(x @ W1 + b1) @ W2 + b2  (dropout = identity).

    x: [..., d_emb]; w1: [d_emb, d_ff]; b1: [d_ff]; w2: [d_ff, d_emb]; b2: [d_emb].
    tile_m / t_ff are optional overrides; by default the largest VMEM-resident
    plan the current TPU generation admits is chosen automatically.
    """
    d_emb, d_ff = w1.shape
    lead = x.shape[:-1]
    assert x.shape[-1] == d_emb and w2.shape == (d_ff, d_emb)
    out_dtype = x.dtype

    x2 = x.reshape(-1, d_emb)
    M = x2.shape[0]

    x_isz = jnp.dtype(x.dtype).itemsize
    w_isz = jnp.dtype(w1.dtype).itemsize
    o_isz = jnp.dtype(out_dtype).itemsize
    f32_out = out_dtype == jnp.float32

    # ---- generation-aware VMEM budget (~15% headroom for Mosaic internals) ----
    vmem_budget = int(_vmem_capacity_bytes() * 0.85)

    def plan_bytes(tm, tf, resident):
        # Weight blocks budgeted double-buffered even though the resident plan
        # requests Buffered(1); keeps the plan valid if that request is ignored.
        acc = 0 if (resident or f32_out) else tm * d_emb * 4
        return int(2 * tm * d_emb * x_isz          # x row tile (double-buffered)
                   + 2 * tm * d_emb * o_isz        # out row tile
                   + 2 * d_emb * tf * w_isz        # W1 block
                   + 2 * tf * d_emb * w_isz        # W2 block
                   + 2 * (tf + d_emb) * w_isz      # b1 / b2 blocks
                   + tm * tf * 4                   # live f32 hidden tile
                   + acc)

    # ---- row-tile candidates (largest first; multiple of 16 for bf16 packing) -
    m_cap = pl.cdiv(M, _ALIGN_M) * _ALIGN_M
    if tile_m is not None:
        tm_req = max(_ALIGN_M, (int(tile_m) // _ALIGN_M) * _ALIGN_M)
        tm_candidates = [min(tm_req, m_cap)]
    else:
        tm_candidates = sorted({min(t, m_cap) for t in
                                (1024, 768, 512, 384, 256, 128, 64, 32, 16)},
                               reverse=True)

    explicit_tf = None
    if t_ff is not None:
        t = int(t_ff)
        if t < d_ff and d_ff % t == 0 and t % 128 == 0:
            explicit_tf = t            # valid lane-aligned chunk; forces chunked plan

    chosen = None
    if explicit_tf is None:
        # Plan A: full W1/W2 resident in VMEM -> weights DMA'd from HBM once total.
        for tm in tm_candidates:
            if plan_bytes(tm, d_ff, True) <= vmem_budget:
                chosen = (tm, d_ff, True)
                break
    if chosen is None:
        # Plan B: chunk d_ff (128-aligned chunk widths only). Maximize tile_m
        # first: HBM weight traffic = (#row tiles) * |W|, intensity ~ tile_m.
        if explicit_tf is not None:
            tf_candidates = [explicit_tf]
        else:
            tf_candidates = ([t for t in range(d_ff - 128, 0, -128) if d_ff % t == 0]
                             or [d_ff])
        for tm in tm_candidates:
            tf = next((t for t in tf_candidates
                       if plan_bytes(tm, t, t == d_ff) <= vmem_budget), None)
            if tf is not None:
                chosen = (tm, tf, tf == d_ff)
                break
        if chosen is None:             # nothing fits cleanly; take the smallest plan
            chosen = (tm_candidates[-1], tf_candidates[-1], tf_candidates[-1] == d_ff)
    tile_m, t_ff, resident = chosen

    # ---- pad ragged row counts to the tile, slice back afterwards -------------
    n_row_tiles = pl.cdiv(M, tile_m)
    m_pad = n_row_tiles * tile_m
    if m_pad != M:
        x2 = jnp.pad(x2, ((0, m_pad - M), (0, 0)))

    need = plan_bytes(tile_m, t_ff, resident)
    vmem_limit = int(min(max(32 * _MIB, (5 * need) // 4), vmem_budget))
    vmem_limit = max(vmem_limit, need)          # never request less than the plan

    weight_passes = 1 if resident else n_row_tiles     # honest HBM traffic estimate
    cost = pl.CostEstimate(
        flops=4 * m_pad * d_emb * d_ff,                 # two matmuls, 2*M*K*N each
        transcendentals=0,
        bytes_accessed=int(m_pad * d_emb * (x_isz + o_isz)
                           + weight_passes * (2 * d_emb * d_ff + d_ff + d_emb) * w_isz),
    )

    b1_2d = b1.reshape(1, d_ff)
    b2_2d = b2.reshape(1, d_emb)

    def run(single_buffer_weights):
        if resident:
            def wspec(shape, index_map):
                if single_buffer_weights:
                    # Constant block index => one DMA total; Buffered(1) also drops
                    # the unused second buffer (halves the weights' VMEM footprint).
                    return pl.BlockSpec(shape, index_map, pipeline_mode=pl.Buffered(1))
                return pl.BlockSpec(shape, index_map)

            kernel = _ffn_kernel_resident
            grid = (n_row_tiles,)
            in_specs = [
                pl.BlockSpec((tile_m, d_emb), lambda i: (i, 0)),     # x row tile
                wspec((d_emb, d_ff), lambda i: (0, 0)),              # W1 (resident)
                wspec((1, d_ff), lambda i: (0, 0)),                  # b1 (resident)
                wspec((d_ff, d_emb), lambda i: (0, 0)),              # W2 (resident)
                wspec((1, d_emb), lambda i: (0, 0)),                 # b2 (resident)
            ]
            out_specs = pl.BlockSpec((tile_m, d_emb), lambda i: (i, 0))
            scratch = []
            dims = ("parallel",)
        else:
            kernel = _ffn_kernel_chunked
            grid = (n_row_tiles, d_ff // t_ff)          # reduction axis last
            in_specs = [
                pl.BlockSpec((tile_m, d_emb), lambda i, f: (i, 0)),  # x row tile
                pl.BlockSpec((d_emb, t_ff), lambda i, f: (0, f)),    # W1 chunk
                pl.BlockSpec((1, t_ff), lambda i, f: (0, f)),        # b1 chunk
                pl.BlockSpec((t_ff, d_emb), lambda i, f: (f, 0)),    # W2 chunk
                pl.BlockSpec((1, d_emb), lambda i, f: (0, 0)),       # b2
            ]
            out_specs = pl.BlockSpec((tile_m, d_emb), lambda i, f: (i, 0))
            # f32 output: reduce directly into the resident output block (no scratch).
            scratch = [] if f32_out else [pltpu.VMEM((tile_m, d_emb), jnp.float32)]
            dims = ("parallel", "arbitrary")

        return pl.pallas_call(
            kernel,
            out_shape=jax.ShapeDtypeStruct((m_pad, d_emb), out_dtype),
            grid_spec=pltpu.PrefetchScalarGridSpec(
                num_scalar_prefetch=0,
                grid=grid,
                in_specs=in_specs,
                out_specs=out_specs,
                scratch_shapes=scratch,
            ),
            compiler_params=pltpu.CompilerParams(
                dimension_semantics=dims,
                vmem_limit_bytes=vmem_limit,
            ),
            cost_estimate=cost,
        )(x2, w1, b1_2d, w2, b2_2d)

    if resident:
        try:
            out = run(single_buffer_weights=True)
        except Exception:
            # pipeline_mode=pl.Buffered(1) unsupported on this jax version; the
            # constant block index still means the weights are DMA'd only once.
            out = run(single_buffer_weights=False)
    else:
        out = run(single_buffer_weights=False)

    if m_pad != M:
        out = out[:M]
    return out.reshape(*lead, d_emb)


def feed_forward_ref(x, w1, b1, w2, b2):
    h = jnp.maximum(
        jnp.dot(x, w1, precision=lax.Precision.HIGHEST,
                preferred_element_type=jnp.float32) + b1, 0.0)
    return jnp.dot(h, w2, precision=lax.Precision.HIGHEST,
                   preferred_element_type=jnp.float32) + b2


if __name__ == "__main__":
    # Small, lane/sublane-friendly demo shapes.
    batch, seq, d_emb, d_ff = 2, 64, 128, 256
    dropout_p = 0.1   # unused at inference time

    key = jax.random.PRNGKey(0)
    kx, k1, kb1, k2, kb2 = jax.random.split(key, 5)
    x = jax.random.normal(kx, (batch, seq, d_emb), dtype=jnp.float32)
    w1 = jax.random.normal(k1, (d_emb, d_ff), dtype=jnp.float32) / jnp.sqrt(float(d_emb))
    b1 = 0.01 * jax.random.normal(kb1, (d_ff,), dtype=jnp.float32)
    w2 = jax.random.normal(k2, (d_ff, d_emb), dtype=jnp.float32) / jnp.sqrt(float(d_ff))
    b2 = 0.01 * jax.random.normal(kb2, (d_emb,), dtype=jnp.float32)

    ref = feed_forward_ref(x, w1, b1, w2, b2)

    # 1) Default auto plan: weights fully resident in VMEM, 1-D row grid.
    out = feed_forward(x, w1, b1, w2, b2)
    jax.block_until_ready(out)
    assert out.shape == x.shape
    assert jnp.allclose(out, ref, atol=1e-3, rtol=1e-3), "resident plan mismatch"

    # 2) Resident plan with several row tiles (weights reused across row tiles).
    out_rt = feed_forward(x, w1, b1, w2, b2, tile_m=64)
    jax.block_until_ready(out_rt)
    assert jnp.allclose(out_rt, ref, atol=1e-3, rtol=1e-3), "multi-row-tile mismatch"

    # 3) Forced chunked-d_ff plan (2-D grid, reduction into the resident f32 output).
    out_ck = feed_forward(x, w1, b1, w2, b2, tile_m=64, t_ff=128)
    jax.block_until_ready(out_ck)
    assert jnp.allclose(out_ck, ref, atol=1e-3, rtol=1e-3), "chunked plan mismatch"

    # 4) Ragged row count (pad to the row tile, slice back).
    x_ragged = x.reshape(-1, d_emb)[:100]
    out_rg = feed_forward(x_ragged, w1, b1, w2, b2)
    jax.block_until_ready(out_rg)
    ref_rg = feed_forward_ref(x_ragged, w1, b1, w2, b2)
    assert out_rg.shape == (100, d_emb)
    assert jnp.allclose(out_rg, ref_rg, atol=1e-3, rtol=1e-3), "ragged mismatch"

    # 5) bf16 production dtypes on the chunked plan (f32 accumulator scratch path).
    xb, w1b, w2b = (a.astype(jnp.bfloat16) for a in (x, w1, w2))
    b1b, b2b = b1.astype(jnp.bfloat16), b2.astype(jnp.bfloat16)
    out_bf = feed_forward(xb, w1b, b1b, w2b, b2b, tile_m=64, t_ff=128)
    jax.block_until_ready(out_bf)
    ref_bf = feed_forward_ref(xb, w1b, b1b, w2b, b2b)   # f32 math on bf16 values
    assert out_bf.dtype == jnp.bfloat16
    assert jnp.allclose(out_bf.astype(jnp.float32), ref_bf, atol=5e-2, rtol=5e-2), \
        "bf16 chunked mismatch"

    print("KERNEL_OK")
</pallas_src>

<mosaic_0001>
module attributes {stable_mosaic.version = 11 : i64} {
  func.func @_ffn_kernel_resident(%arg0: i32, %arg1: memref<128x128xf32, #tpu.memory_space<vmem>>, %arg2: memref<128x256xf32, #tpu.memory_space<vmem>>, %arg3: memref<1x256xf32, #tpu.memory_space<vmem>>, %arg4: memref<256x128xf32, #tpu.memory_space<vmem>>, %arg5: memref<1x128xf32, #tpu.memory_space<vmem>>, %arg6: memref<128x128xf32, #tpu.memory_space<vmem>>) attributes {dimension_semantics = [#tpu.dimension_semantics<parallel>], iteration_bounds = array<i64: 1>, scalar_prefetch = 0 : i64, scratch_operands = 0 : i64, tpu.core_type = #tpu.core_type<tc>, window_params = [{transform_indices = @transform_0, window_bounds = array<i64: 128, 128>}, {pipeline_mode = #tpu.pipeline_mode<synchronous>, transform_indices = @transform_1, window_bounds = array<i64: 128, 256>}, {pipeline_mode = #tpu.pipeline_mode<synchronous>, transform_indices = @transform_2, window_bounds = array<i64: 1, 256>}, {pipeline_mode = #tpu.pipeline_mode<synchronous>, transform_indices = @transform_3, window_bounds = array<i64: 256, 128>}, {pipeline_mode = #tpu.pipeline_mode<synchronous>, transform_indices = @transform_4, window_bounds = array<i64: 1, 128>}, {transform_indices = @transform_5, window_bounds = array<i64: 128, 128>}]} {
    %c0 = arith.constant 0 : index
    %c0_0 = arith.constant 0 : index
    %0 = vector.load %arg1[%c0, %c0_0] : memref<128x128xf32, #tpu.memory_space<vmem>>, vector<128x128xf32>
    %c0_1 = arith.constant 0 : index
    %c0_2 = arith.constant 0 : index
    %1 = vector.load %arg2[%c0_1, %c0_2] : memref<128x256xf32, #tpu.memory_space<vmem>>, vector<128x256xf32>
    %cst = arith.constant dense<0.000000e+00> : vector<128x256xf32>
    %2 = tpu.matmul %0, %1, %cst {dimension_numbers = #tpu.dot_dimension_numbers<[1], [0], [0], [1], [0, 0, 1, 1], [], []>} : vector<128x128xf32>, vector<128x256xf32>, vector<128x256xf32> -> vector<128x256xf32>
    %c0_3 = arith.constant 0 : index
    %c0_4 = arith.constant 0 : index
    %3 = vector.load %arg3[%c0_3, %c0_4] : memref<1x256xf32, #tpu.memory_space<vmem>>, vector<1x256xf32>
    %4 = vector.broadcast %3 : vector<1x256xf32> to vector<128x256xf32>
    %5 = arith.addf %2, %4 : vector<128x256xf32>
    %cst_5 = arith.constant 0.000000e+00 : f32
    %6 = vector.broadcast %cst_5 : f32 to vector<128x256xf32>
    %7 = arith.maximumf %5, %6 : vector<128x256xf32>
    %c0_6 = arith.constant 0 : index
    %c0_7 = arith.constant 0 : index
    %8 = vector.load %arg4[%c0_6, %c0_7] : memref<256x128xf32, #tpu.memory_space<vmem>>, vector<256x128xf32>
    %cst_8 = arith.constant dense<0.000000e+00> : vector<128x128xf32>
    %9 = tpu.matmul %7, %8, %cst_8 {dimension_numbers = #tpu.dot_dimension_numbers<[1], [0], [0], [1], [0, 0, 1, 1], [], []>} : vector<128x256xf32>, vector<256x128xf32>, vector<128x128xf32> -> vector<128x128xf32>
    %c0_9 = arith.constant 0 : index
    %c0_10 = arith.constant 0 : index
    %10 = vector.load %arg5[%c0_9, %c0_10] : memref<1x128xf32, #tpu.memory_space<vmem>>, vector<1x128xf32>
    %11 = vector.broadcast %10 : vector<1x128xf32> to vector<128x128xf32>
    %12 = arith.addf %9, %11 : vector<128x128xf32>
    %c0_11 = arith.constant 0 : index
    %c0_12 = arith.constant 0 : index
    %13 = vector.load %arg6[%c0_11, %c0_12] : memref<128x128xf32, #tpu.memory_space<vmem>>, vector<128x128xf32>
    tpu.vector_store %arg6[%c0_11, %c0_12], %12 {strides = array<i32>} : memref<128x128xf32, #tpu.memory_space<vmem>>, vector<128x128xf32>,
    return
  }
  func.func @transform_0(%arg0: i32) -> (i32, i32) {
    %c0_i32 = arith.constant 0 : i32
    %c0_i32_0 = arith.constant 0 : i32
    return %arg0, %c0_i32 : i32, i32
  }
  func.func @transform_1(%arg0: i32) -> (i32, i32) {
    %c0_i32 = arith.constant 0 : i32
    %c0_i32_0 = arith.constant 0 : i32
    %c0_i32_1 = arith.constant 0 : i32
    return %c0_i32, %c0_i32_0 : i32, i32
  }
  func.func @transform_2(%arg0: i32) -> (i32, i32) {
    %c0_i32 = arith.constant 0 : i32
    %c0_i32_0 = arith.constant 0 : i32
    %c0_i32_1 = arith.constant 0 : i32
    return %c0_i32, %c0_i32_0 : i32, i32
  }
  func.func @transform_3(%arg0: i32) -> (i32, i32) {
    %c0_i32 = arith.constant 0 : i32
    %c0_i32_0 = arith.constant 0 : i32
    %c0_i32_1 = arith.constant 0 : i32
    return %c0_i32, %c0_i32_0 : i32, i32
  }
  func.func @transform_4(%arg0: i32) -> (i32, i32) {
    %c0_i32 = arith.constant 0 : i32
    %c0_i32_0 = arith.constant 0 : i32
    %c0_i32_1 = arith.constant 0 : i32
    return %c0_i32, %c0_i32_0 : i32, i32
  }
  func.func @transform_5(%arg0: i32) -> (i32, i32) {
    %c0_i32 = arith.constant 0 : i32
    %c0_i32_0 = arith.constant 0 : i32
    return %arg0, %c0_i32 : i32, i32
  }
}

module attributes {stable_mosaic.version = 11 : i64} {
  func.func @_ffn_kernel_resident(%arg0: i32, %arg1: memref<128x128xf32, #tpu.memory_space<vmem>>, %arg2: memref<128x256xf32, #tpu.memory_space<vmem>>, %arg3: memref<1x256xf32, #tpu.memory_space<vmem>>, %arg4: memref<256x128xf32, #tpu.memory_space<vmem>>, %arg5: memref<1x128xf32, #tpu.memory_space<vmem>>, %arg6: memref<128x128xf32, #tpu.memory_space<vmem>>) attributes {dimension_semantics = [#tpu.dimension_semantics<parallel>], iteration_bounds = array<i64: 1>, scalar_prefetch = 0 : i64, scratch_operands = 0 : i64, tpu.core_type = #tpu.core_type<tc>, window_params = [{transform_indices = @transform_0, window_bounds = array<i64: 128, 128>}, {pipeline_mode = #tpu.pipeline_mode<synchronous>, transform_indices = @transform_1, window_bounds = array<i64: 128, 256>}, {pipeline_mode = #tpu.pipeline_mode<synchronous>, transform_indices = @transform_2, window_bounds = array<i64: 1, 256>}, {pipeline_mode = #tpu.pipeline_mode<synchronous>, transform_indices = @transform_3, window_bounds = array<i64: 256, 128>}, {pipeline_mode = #tpu.pipeline_mode<synchronous>, transform_indices = @transform_4, window_bounds = array<i64: 1, 128>}, {transform_indices = @transform_5, window_bounds = array<i64: 128, 128>}]} {
    %c0 = arith.constant 0 : index
    %c0_0 = arith.constant 0 : index
    %0 = vector.load %arg1[%c0, %c0_0] : memref<128x128xf32, #tpu.memory_space<vmem>>, vector<128x128xf32>
    %c0_1 = arith.constant 0 : index
    %c0_2 = arith.constant 0 : index
    %1 = vector.load %arg2[%c0_1, %c0_2] : memref<128x256xf32, #tpu.memory_space<vmem>>, vector<128x256xf32>
    %cst = arith.constant dense<0.000000e+00> : vector<128x256xf32>
    %2 = tpu.matmul %0, %1, %cst {dimension_numbers = #tpu.dot_dimension_numbers<[1], [0], [0], [1], [0, 0, 1, 1], [], []>} : vector<128x128xf32>, vector<128x256xf32>, vector<128x256xf32> -> vector<128x256xf32>
    %c0_3 = arith.constant 0 : index
    %c0_4 = arith.constant 0 : index
    %3 = vector.load %arg3[%c0_3, %c0_4] : memref<1x256xf32, #tpu.memory_space<vmem>>, vector<1x256xf32>
    %4 = vector.broadcast %3 : vector<1x256xf32> to vector<128x256xf32>
    %5 = arith.addf %2, %4 : vector<128x256xf32>
    %cst_5 = arith.constant 0.000000e+00 : f32
    %6 = vector.broadcast %cst_5 : f32 to vector<128x256xf32>
    %7 = arith.maximumf %5, %6 : vector<128x256xf32>
    %c0_6 = arith.constant 0 : index
    %c0_7 = arith.constant 0 : index
    %8 = vector.load %arg4[%c0_6, %c0_7] : memref<256x128xf32, #tpu.memory_space<vmem>>, vector<256x128xf32>
    %cst_8 = arith.constant dense<0.000000e+00> : vector<128x128xf32>
    %9 = tpu.matmul %7, %8, %cst_8 {dimension_numbers = #tpu.dot_dimension_numbers<[1], [0], [0], [1], [0, 0, 1, 1], [], []>} : vector<128x256xf32>, vector<256x128xf32>, vector<128x128xf32> -> vector<128x128xf32>
    %c0_9 = arith.constant 0 : index
    %c0_10 = arith.constant 0 : index
    %10 = vector.load %arg5[%c0_9, %c0_10] : memref<1x128xf32, #tpu.memory_space<vmem>>, vector<1x128xf32>
    %11 = vector.broadcast %10 : vector<1x128xf32> to vector<128x128xf32>
    %12 = arith.addf %9, %11 : vector<128x128xf32>
    %c0_11 = arith.constant 0 : index
    %c0_12 = arith.constant 0 : index
    %13 = vector.load %arg6[%c0_11, %c0_12] : memref<128x128xf32, #tpu.memory_space<vmem>>, vector<128x128xf32>
    tpu.vector_store %arg6[%c0_11, %c0_12], %12 {strides = array<i32>} : memref<128x128xf32, #tpu.memory_space<vmem>>, vector<128x128xf32>,
    return
  }
  func.func @transform_0(%arg0: i32) -> (i32, i32) {
    %c0_i32 = arith.constant 0 : i32
    %c0_i32_0 = arith.constant 0 : i32
    return %arg0, %c0_i32 : i32, i32
  }
  func.func @transform_1(%arg0: i32) -> (i32, i32) {
    %c0_i32 = arith.constant 0 : i32
    %c0_i32_0 = arith.constant 0 : i32
    %c0_i32_1 = arith.constant 0 : i32
    return %c0_i32, %c0_i32_0 : i32, i32
  }
  func.func @transform_2(%arg0: i32) -> (i32, i32) {
    %c0_i32 = arith.constant 0 : i32
    %c0_i32_0 = arith.constant 0 : i32
    %c0_i32_1 = arith.constant 0 : i32
    return %c0_i32, %c0_i32_0 : i32, i32
  }
  func.func @transform_3(%arg0: i32) -> (i32, i32) {
    %c0_i32 = arith.constant 0 : i32
    %c0_i32_0 = arith.constant 0 : i32
    %c0_i32_1 = arith.constant 0 : i32
    return %c0_i32, %c0_i32_0 : i32, i32
  }
  func.func @transform_4(%arg0: i32) -> (i32, i32) {
    %c0_i32 = arith.constant 0 : i32
    %c0_i32_0 = arith.constant 0 : i32
    %c0_i32_1 = arith.constant 0 : i32
    return %c0_i32, %c0_i32_0 : i32, i32
  }
  func.func @transform_5(%arg0: i32) -> (i32, i32) {
    %c0_i32 = arith.constant 0 : i32
    %c0_i32_0 = arith.constant 0 : i32
    return %arg0, %c0_i32 : i32, i32
  }
}

</mosaic_0001>

<bundles_post_ra>
// kernel: tpu_custom_call.1
= control target key start
LH: loop header
LB: loop body
LE: loop exit
PB: predicated region body
PF: predicated region fallthrough
CT: control target
= control target key end

     0   :  { %10 = vsyncpa [#allocation3], 0  ;;  %s953_s0 = inlined_call_operand.hbm [shape: f32[128,128], index: 0, kind: input, shape index: {}]   ;;  %s954_s1 = inlined_call_operand.hbm [shape: f32[128,256], index: 1, kind: input, shape index: {}]   ;;  %s955_s2 = inlined_call_operand.vmem [shape: f32[1,256], index: 2, kind: input, shape index: {}]   ;;  %s956_s3 = inlined_call_operand.hbm [shape: f32[256,128], index: 3, kind: input, shape index: {}]   ;;  %s957_s4 = inlined_call_operand.vmem [shape: f32[1,128], index: 4, kind: input, shape index: {}]   ;;  %s958_s5 = inlined_call_operand.hbm [shape: f32[128,128], index: 5, kind: output, shape index: {}]  }
   0x1   :  { %11 = vsyncpa [#allocation6], 0 }
   0x2   :  { %12 = vsyncpa [#allocation4], 0  ;;  %s781_s18 = smov [#allocation5]   ;;  %s687_s22 = scalar_lea.hbm %s954_s1, 4096 }
   0x3   :  { %s30_s19 = sshll.u32 %s781_s18, 4  ;;  %p688_p0 = scmp.ne.s32.totalorder %s954_s1, %s687_s22  ;;  %s31_s19 = int_to_ptr.vmem [resolvable:$true] %s30_s19 }
   0x4   :  { %p691_p1 = scmp.lt.u32.totalorder %s687_s22, %s954_s1 }
   0x6   :  { %p693_p2 = pnand %p691_p1, %p688_p0 }
   0x8   :  { %696 = shalt.err (!%p693_p2)
}
   0x9   :  { %s697_s27 = scalar_lea.vmem %s31_s19, 4096  ;;  %p702_p4 = scmp.lt.s32.totalorder %s31_s19, %s31_s19 }
   0xa   :  { %p698_p3 = scmp.ne.s32.totalorder %s31_s19, %s697_s27  ;;  %p703_p5 = scmp.lt.s32.totalorder %s697_s27, %s697_s27 }
   0xc   :  { %p704_p6 = por %p703_p5, %p702_p4 }
   0xe   :  { %p705_p7 = pnand %p704_p6, %p698_p3 }
  0x10   :  { %708 = shalt.err (!%p705_p7)
}
  0x11   :  { %s782_s28 = smov 256   ;;  %s783_s29 = smov 16  }
  0x12   :  { %36 = dma.hbm_to_vmem [thread:$0]  %s954_s1, 4096, %s31_s19, [#allocation6], %s782_s28, %s782_s28, %s783_s29  }
  0x13   :  { %s784_s7 = smov [#allocation2]   ;;  %s709_s11 = scalar_lea.hbm %s953_s0, 2048 }
  0x14   :  { %s18_s8 = sshll.u32 %s784_s7, 4  ;;  %p710_p8 = scmp.ne.s32.totalorder %s953_s0, %s709_s11  ;;  %s19_s8 = int_to_ptr.vmem [resolvable:$true] %s18_s8 }
  0x15   :  { %p713_p9 = scmp.lt.u32.totalorder %s709_s11, %s953_s0 }
  0x17   :  { %p715_p10 = pnand %p713_p9, %p710_p8 }
  0x19   :  { %718 = shalt.err (!%p715_p10)
}
  0x1a   :  { %s719_s16 = scalar_lea.vmem %s19_s8, 2048  ;;  %p724_p12 = scmp.lt.s32.totalorder %s19_s8, %s19_s8 }
  0x1b   :  { %p720_p11 = scmp.ne.s32.totalorder %s19_s8, %s719_s16  ;;  %p725_p13 = scmp.lt.s32.totalorder %s719_s16, %s719_s16 }
  0x1d   :  { %p726_p0 = por %p725_p13, %p724_p12 }
  0x1f   :  { %p727_p1 = pnand %p726_p0, %p720_p11 }
  0x21   :  { %730 = shalt.err (!%p727_p1)
}
  0x22   :  { %s785_s1 = smov 128   ;;  %s786_s17 = smov 8  }
  0x23   :  { %24 = dma.hbm_to_vmem [thread:$0]  %s953_s0, 2048, %s19_s8, [#allocation3], %s785_s1, %s785_s1, %s786_s17  }
  0x24   :  { %s787_s20 = smov [#allocation7]   ;;  %s731_s24 = scalar_lea.hbm %s956_s3, 4096 }
  0x25   :  { %s44_s21 = sshll.u32 %s787_s20, 4  ;;  %p732_p2 = scmp.ne.s32.totalorder %s956_s3, %s731_s24  ;;  %s45_s21 = int_to_ptr.vmem [resolvable:$true] %s44_s21 }
  0x26   :  { %p735_p3 = scmp.lt.u32.totalorder %s731_s24, %s956_s3 }
  0x28   :  { %p737_p4 = pnand %p735_p3, %p732_p2 }
  0x2a   :  { %740 = shalt.err (!%p737_p4)
}
  0x2b   :  { %s741_s29 = scalar_lea.vmem %s45_s21, 4096  ;;  %p746_p6 = scmp.lt.s32.totalorder %s45_s21, %s45_s21 }
  0x2c   :  { %p742_p5 = scmp.ne.s32.totalorder %s45_s21, %s741_s29  ;;  %p747_p7 = scmp.lt.s32.totalorder %s741_s29, %s741_s29 }
  0x2e   :  { %p748_p8 = por %p747_p7, %p746_p6 }
  0x30   :  { %p749_p9 = pnand %p748_p8, %p742_p5 }
  0x32   :  { %752 = shalt.err (!%p749_p9)
}
  0x33   :  { %50 = dma.hbm_to_vmem [thread:$0]  %s956_s3, 4096, %s45_s21, [#allocation6], %s785_s1, %s785_s1, %s786_s17  }
  0x34   :  { %775 = dma.done.wait [#allocation3], 2048  }
  0x35   :  { %776 = vsyncadd [#allocation3], 4294965248 }
  0x36   :  { %777 = dma.done.wait [#allocation6], 8192  }
  0x37   :  { %778 = vsyncadd [#allocation6], 4294959104  ;;  %v788_v0 = vmov 0.0   ;;  %v79_v1 = vld [vmem:[#allocation5 + $0x8] sm:$0xff]  ;;  %v81_v2 = vld [vmem:[#allocation5 + $0x18] sm:$0xff] }
  0x38   :  { %186 = vmatprep.mubr.f32.mxu0 %v788_v0  ;;  %v78_v3 = vld [vmem:[#allocation5] sm:$0xff]  ;;  %v614_v4 = vpack.c.bf16 %v81_v2, %v79_v1  ;;  %v80_v5 = vld [vmem:[#allocation5 + $0x10] sm:$0xff]  ;;  %v83_v6 = vld [vmem:[#allocation5 + $0x28] sm:$0xff] }
  0x39   :  { %v85_v7 = vld [vmem:[#allocation5 + $0x38] sm:$0xff]  ;;  %v616_v8 = vpack.c.bf16 %v80_v5, %v78_v3  ;;  %v82_v10 = vld [vmem:[#allocation5 + $0x20] sm:$0xff]  ;;  %v84_v11 = vld [vmem:[#allocation5 + $0x30] sm:$0xff] }
  0x3a   :  { %v618_v9 = vpack.c.bf16 %v85_v7, %v83_v6  ;;  %v87_v12 = vld [vmem:[#allocation5 + $0x48] sm:$0xff]  ;;  %615 = vmatprep.subr.bf16.mxu0 %v614_v4  ;;  %v89_v13 = vld [vmem:[#allocation5 + $0x58] sm:$0xff]  ;;  %v620_v14 = vpack.c.bf16 %v84_v11, %v82_v10  ;;  %v86_v16 = vld [vmem:[#allocation5 + $0x40] sm:$0xff] }
  0x3b   :  { %617 = vmatpush1.bf16.msra.mxu0 %v616_v8  ;;  %v622_v15 = vpack.c.bf16 %v89_v13, %v87_v12  ;;  %v88_v17 = vld [vmem:[#allocation5 + $0x50] sm:$0xff]  ;;  %v91_v18 = vld [vmem:[#allocation5 + $0x68] sm:$0xff]  ;;  %v93_v19 = vld [vmem:[#allocation5 + $0x78] sm:$0xff] }
  0x3c   :  { %619 = vmatprep.subr.bf16.mxu0 %v618_v9  ;;  %v624_v20 = vpack.c.bf16 %v88_v17, %v86_v16  ;;  %v626_v21 = vpack.c.bf16 %v93_v19, %v91_v18  ;;  %v90_v22 = vld [vmem:[#allocation5 + $0x60] sm:$0xff]  ;;  %v92_v23 = vld [vmem:[#allocation5 + $0x70] sm:$0xff]  ;;  %v95_v24 = vld [vmem:[#allocation5 + $0x88] sm:$0xff] }
  0x3d   :  { %v97_v25 = vld [vmem:[#allocation5 + $0x98] sm:$0xff]  ;;  %v628_v26 = vpack.c.bf16 %v92_v23, %v90_v22  ;;  %v94_v28 = vld [vmem:[#allocation5 + $0x80] sm:$0xff]  ;;  %v96_v29 = vld [vmem:[#allocation5 + $0x90] sm:$0xff] }
  0x3e   :  { %v630_v27 = vpack.c.bf16 %v97_v25, %v95_v24  ;;  %v99_v30 = vld [vmem:[#allocation5 + $0xa8] sm:$0xff]  ;;  %v101_v31 = vld [vmem:[#allocation5 + $0xb8] sm:$0xff]  ;;  %v98_v32 = vld [vmem:[#allocation5 + $0xa0] sm:$0xff]  ;;  %v632_v34 = vpack.c.bf16 %v96_v29, %v94_v28 }
  0x3f   :  { %621 = vmatpush1.bf16.msra.mxu0 %v620_v14  ;;  %v100_v33 = vld [vmem:[#allocation5 + $0xb0] sm:$0xff]  ;;  %v103_v35 = vld [vmem:[#allocation5 + $0xc8] sm:$0xff]  ;;  %v105_v36 = vld [vmem:[#allocation5 + $0xd8] sm:$0xff]  ;;  %v634_v40 = vpack.c.bf16 %v101_v31, %v99_v30 }
  0x40   :  { %623 = vmatprep.subr.bf16.mxu0 %v622_v15  ;;  %v331_v37 = vld [vmem:[#allocation7 + $0x80] sm:$0xff]  ;;  %v332_v38 = vld [vmem:[#allocation7 + $0x88] sm:$0xff]  ;;  %v333_v43 = vld [vmem:[#allocation7 + $0x90] sm:$0xff]  ;;  %v636_v51 = vpack.c.bf16 %v100_v33, %v98_v32  ;;  %v638_v55 = vpack.c.bf16 %v105_v36, %v103_v35 }
  0x41   :  { %v315_v39 = vld [vmem:[#allocation7] sm:$0xff]  ;;  %v646_v41 = vpack.c.bf16 %v332_v38, %v331_v37  ;;  %v316_v42 = vld [vmem:[#allocation7 + $0x8] sm:$0xff]  ;;  %v334_v44 = vld [vmem:[#allocation7 + $0x98] sm:$0xff] }
  0x42   :  { %v648_v45 = vpack.c.bf16 %v316_v42, %v315_v39  ;;  %v650_v46 = vpack.c.bf16 %v334_v44, %v333_v43  ;;  %v317_v47 = vld [vmem:[#allocation7 + $0x10] sm:$0xff]  ;;  %v318_v48 = vld [vmem:[#allocation7 + $0x18] sm:$0xff]  ;;  %v335_v49 = vld [vmem:[#allocation7 + $0xa0] sm:$0xff] }
  0x43   :  { %625 = vmatpush1.bf16.msra.mxu0 %v624_v20  ;;  %647 = vmatprep.subr.bf16.mxu1 %v646_v41  ;;  %v336_v50 = vld [vmem:[#allocation7 + $0xa8] sm:$0xff]  ;;  %v102_v52 = vld [vmem:[#allocation5 + $0xc0] sm:$0xff]  ;;  %v104_v53 = vld [vmem:[#allocation5 + $0xd0] sm:$0xff]  ;;  %v652_v54 = vpack.c.bf16 %v318_v48, %v317_v47 }
  0x44   :  { %627 = vmatprep.subr.bf16.mxu0 %v626_v21  ;;  %649 = vmatpush3.bf16.msra.mxu1 %v648_v45  ;;  %v107_v56 = vld [vmem:[#allocation5 + $0xe8] sm:$0xff]  ;;  %v654_v57 = vpack.c.bf16 %v336_v50, %v335_v49  ;;  %v319_v58 = vld [vmem:[#allocation7 + $0x20] sm:$0xff]  ;;  %v109_v60 = vld [vmem:[#allocation5 + $0xf8] sm:$0xff]  ;;  %v640_v63 = vpack.c.bf16 %v104_v53, %v102_v52  ;;  %v112_v50 = vlaneseq }
  0x45   :  { %651 = vmatprep.subr.bf16.mxu1 %v650_v46  ;;  %v320_v59 = vld [vmem:[#allocation7 + $0x28] sm:$0xff]  ;;  %v337_v61 = vld [vmem:[#allocation7 + $0xb0] sm:$0xff]  ;;  %v338_v62 = vld [vmem:[#allocation7 + $0xb8] sm:$0xff]  ;;  %v642_v3 = vpack.c.bf16 %v109_v60, %v107_v56 }
  0x46   :  { %v106_v1 = vld [vmem:[#allocation5 + $0xe0] sm:$0xff]  ;;  %v656_v2 = vpack.c.bf16 %v320_v59, %v319_v58  ;;  %v108_v4 = vld [vmem:[#allocation5 + $0xf0] sm:$0xff]  ;;  %v658_v5 = vpack.c.bf16 %v338_v62, %v337_v61  ;;  %v322_v7 = vld [vmem:[#allocation7 + $0x38] sm:$0xff] }
  0x47   :  { %629 = vmatpush1.bf16.msra.mxu0 %v628_v26  ;;  %v321_v6 = vld [vmem:[#allocation7 + $0x30] sm:$0xff]  ;;  %v339_v8 = vld [vmem:[#allocation7 + $0xc0] sm:$0xff]  ;;  %v340_v9 = vld [vmem:[#allocation7 + $0xc8] sm:$0xff]  ;;  %v644_v10 = vpack.c.bf16 %v108_v4, %v106_v1 }
  0x48   :  { %631 = vmatprep.subr.bf16.mxu0 %v630_v27  ;;  %653 = vmatpush3.bf16.msra.mxu1 %v652_v54  ;;  %v660_v11 = vpack.c.bf16 %v322_v7, %v321_v6  ;;  %v662_v12 = vpack.c.bf16 %v340_v9, %v339_v8  ;;  %v323_v13 = vld [vmem:[#allocation7 + $0x40] sm:$0xff]  ;;  %v324_v14 = vld [vmem:[#allocation7 + $0x48] sm:$0xff]  ;;  %v341_v15 = vld [vmem:[#allocation7 + $0xd0] sm:$0xff] }
  0x49   :  { %655 = vmatprep.subr.bf16.mxu1 %v654_v57  ;;  %v342_v16 = vld [vmem:[#allocation7 + $0xd8] sm:$0xff]  ;;  %v62_v17 = vld [vmem:[#allocation2] sm:$0xff]  ;;  %v664_v18 = vpack.c.bf16 %v324_v14, %v323_v13  ;;  %v325_v20 = vld [vmem:[#allocation7 + $0x50] sm:$0xff] }
  0x4a   :  { %v666_v19 = vpack.c.bf16 %v342_v16, %v341_v15  ;;  %v326_v21 = vld [vmem:[#allocation7 + $0x58] sm:$0xff]  ;;  %v343_v22 = vld [vmem:[#allocation7 + $0xe0] sm:$0xff]  ;;  %v344_v23 = vld [vmem:[#allocation7 + $0xe8] sm:$0xff] }
  0x4b   :  { %633 = vmatpush1.bf16.msra.mxu0 %v632_v34  ;;  %v63_v24 = vld [vmem:[#allocation2 + $0x8] sm:$0xff]  ;;  %v668_v25 = vpack.c.bf16 %v326_v21, %v325_v20  ;;  %v670_v26 = vpack.c.bf16 %v344_v23, %v343_v22  ;;  %v64_v27 = vld [vmem:[#allocation2 + $0x10] sm:$0xff]  ;;  %v65_v28 = vld [vmem:[#allocation2 + $0x18] sm:$0xff] }
  0x4c   :  { %635 = vmatprep.subr.bf16.mxu0 %v634_v40  ;;  %657 = vmatpush3.bf16.msra.mxu1 %v656_v2  ;;  %v66_v29 = vld [vmem:[#allocation2 + $0x20] sm:$0xff]  ;;  %v67_v30 = vld [vmem:[#allocation2 + $0x28] sm:$0xff]  ;;  %v68_v31 = vld [vmem:[#allocation2 + $0x30] sm:$0xff] }
  0x4d   :  { %659 = vmatprep.subr.bf16.mxu1 %v658_v5  ;;  %v69_v32 = vld [vmem:[#allocation2 + $0x38] sm:$0xff]  ;;  %v70_v33 = vld [vmem:[#allocation2 + $0x40] sm:$0xff]  ;;  %v71_v34 = vld [vmem:[#allocation2 + $0x48] sm:$0xff] }
  0x4e   :  { %v72_v35 = vld [vmem:[#allocation2 + $0x50] sm:$0xff]  ;;  %v73_v36 = vld [vmem:[#allocation2 + $0x58] sm:$0xff]  ;;  %v74_v37 = vld [vmem:[#allocation2 + $0x60] sm:$0xff] }
  0x4f   :  { %637 = vmatpush1.bf16.msra.mxu0 %v636_v51  ;;  %v75_v38 = vld [vmem:[#allocation2 + $0x68] sm:$0xff]  ;;  %v76_v39 = vld [vmem:[#allocation2 + $0x70] sm:$0xff]  ;;  %v77_v40 = vld [vmem:[#allocation2 + $0x78] sm:$0xff]  ;;  %v113_v51 = vshrl.u32 %v112_v50, 7 }
  0x50   :  { %639 = vmatprep.subr.bf16.mxu0 %v638_v55  ;;  %661 = vmatpush3.bf16.msra.mxu1 %v660_v11  ;;  %v327_v41 = vld [vmem:[#allocation7 + $0x60] sm:$0xff]  ;;  %v328_v42 = vld [vmem:[#allocation7 + $0x68] sm:$0xff]  ;;  %v345_v44 = vld [vmem:[#allocation7 + $0xf0] sm:$0xff] }
  0x51   :  { %663 = vmatprep.subr.bf16.mxu1 %v662_v12  ;;  %v672_v43 = vpack.c.bf16 %v328_v42, %v327_v41  ;;  %v346_v45 = vld [vmem:[#allocation7 + $0xf8] sm:$0xff]  ;;  %v329_v47 = vld [vmem:[#allocation7 + $0x70] sm:$0xff]  ;;  %v114_v52 = vsub.s32 0, %v113_v51  ;;  %v118_v53 = vsub.s32 1, %v113_v51 }
  0x52   :  { %v674_v46 = vpack.c.bf16 %v346_v45, %v345_v44  ;;  %v330_v48 = vld [vmem:[#allocation7 + $0x78] sm:$0xff] }
  0x53   :  { %641 = vmatpush1.bf16.msra.mxu0 %v640_v63  ;;  %v676_v49 = vpack.c.bf16 %v330_v48, %v329_v47 }
  0x54   :  { %643 = vmatprep.subr.bf16.mxu0 %v642_v3  ;;  %665 = vmatpush3.bf16.msra.mxu1 %v664_v18 }
  0x55   :  { %667 = vmatprep.subr.bf16.mxu1 %v666_v19 }
  0x57   :  { %645 = vmatpush1.bf16.msra.mxu0 %v644_v10 }
  0x58   :  { %669 = vmatpush3.bf16.msra.mxu1 %v668_v25 }
  0x59   :  { %671 = vmatprep.subr.bf16.mxu1 %v670_v26 }
  0x5a   :  { %187 = vmatmul.mubr.f32.vlgmr.msra.gmra.mrb[0].mxu0 %v62_v17 }
  0x5b   :  { %192 = vmatprep.mubr.f32.mxu0 %v788_v0 }
  0x5c   :  { %673 = vmatpush3.bf16.msra.mxu1 %v672_v43 }
  0x5d   :  { %675 = vmatprep.subr.bf16.mxu1 %v674_v46 }
  0x5e   :  { %193 = vmatmul.mubr.f32.gmra.mrb[2].mxu0 %v63_v24 }
  0x5f   :  { %198 = vmatprep.mubr.f32.mxu0 %v788_v0 }
  0x60   :  { %677 = vmatpush3.bf16.msra.mxu1 %v676_v49 }
  0x62   :  { %199 = vmatmul.mubr.f32.gmra.mrb[4].mxu0 %v64_v27 }
  0x63   :  { %204 = vmatprep.mubr.f32.mxu0 %v788_v0 }
  0x66   :  { %205 = vmatmul.mubr.f32.gmra.mrb[6].mxu0 %v65_v28 }
  0x67   :  { %210 = vmatprep.mubr.f32.mxu0 %v788_v0 }
  0x6a   :  { %211 = vmatmul.mubr.f32.gmra.mrb[8].mxu0 %v66_v29 }
  0x6b   :  { %216 = vmatprep.mubr.f32.mxu0 %v788_v0 }
  0x6e   :  { %217 = vmatmul.mubr.f32.gmra.mrb[10].mxu0 %v67_v30 }
  0x6f   :  { %222 = vmatprep.mubr.f32.mxu0 %v788_v0 }
  0x72   :  { %223 = vmatmul.mubr.f32.gmra.mrb[12].mxu0 %v68_v31 }
  0x73   :  { %228 = vmatprep.mubr.f32.mxu0 %v788_v0 }
  0x76   :  { %229 = vmatmul.mubr.f32.gmra.mrb[14].mxu0 %v69_v32 }
  0x77   :  { %234 = vmatprep.mubr.f32.mxu0 %v788_v0 }
  0x7a   :  { %235 = vmatmul.mubr.f32.gmra.mrb[16].mxu0 %v70_v33 }
  0x7b   :  { %240 = vmatprep.mubr.f32.mxu0 %v788_v0 }
  0x7e   :  { %241 = vmatmul.mubr.f32.gmra.mrb[18].mxu0 %v71_v34 }
  0x7f   :  { %246 = vmatprep.mubr.f32.mxu0 %v788_v0 }
  0x82   :  { %247 = vmatmul.mubr.f32.gmra.mrb[20].mxu0 %v72_v35 }
  0x83   :  { %252 = vmatprep.mubr.f32.mxu0 %v788_v0 }
  0x86   :  { %253 = vmatmul.mubr.f32.gmra.mrb[22].mxu0 %v73_v36 }
  0x87   :  { %258 = vmatprep.mubr.f32.mxu0 %v788_v0 }
  0x8a   :  { %259 = vmatmul.mubr.f32.gmra.mrb[24].mxu0 %v74_v37 }
  0x8b   :  { %264 = vmatprep.mubr.f32.mxu0 %v788_v0 }
  0x8e   :  { %265 = vmatmul.mubr.f32.gmra.mrb[26].mxu0 %v75_v38 }
  0x8f   :  { %270 = vmatprep.mubr.f32.mxu0 %v788_v0 }
  0x92   :  { %271 = vmatmul.mubr.f32.gmra.mrb[28].mxu0 %v76_v39 }
  0x93   :  { %276 = vmatprep.mubr.f32.mxu0 %v788_v0  ;;  %v110_v0 = vld [vmem:[%s955_s2] sm:$0x3] }
  0x94   :  { %v881_v54 = vrot.slane %v110_v0, %v114_v52  ;;  %v883_v55 = vrot.slane %v110_v0, %v118_v53 }
  0x96   :  { %277 = vmatmul.mubr.f32.gmra.mrb[30].mxu0 %v77_v40 }
 0x12d   :  { %v188_v56 = vpop.f32.mrb[0].mxu0 }
 0x12e   :  { %v189_v57 = vadd.f32 %v188_v56, %v881_v54  ;;  %v190_v58 = vpop.f32.mrb[1].mxu0 }
 0x12f   :  { %v191_v59 = vadd.f32 %v190_v58, %v883_v55 }
 0x130   :  { %v283_v62 = vmax.f32 %v189_v57, 0.0 }
 0x131   :  { %v194_v60 = vpop.f32.mrb[2].mxu0  ;;  %v284_v61 = vmax.f32 %v191_v59, 0.0 }
 0x132   :  { %v195_v63 = vadd.f32 %v194_v60, %v881_v54  ;;  %v196_v1 = vpop.f32.mrb[3].mxu0 }
 0x133   :  { %v197_v2 = vadd.f32 %v196_v1, %v883_v55  ;;  %418 = vmatprep.mubr.f32.mxu1 %v284_v61 }
 0x134   :  { %419 = vmatmul.mubr.f32.vlgmr.msra.gmra.mrb[0].mxu1 %v283_v62  ;;  %v285_v5 = vmax.f32 %v195_v63, 0.0 }
 0x135   :  { %v286_v3 = vmax.f32 %v197_v2, 0.0  ;;  %v200_v4 = vpop.f32.mrb[4].mxu0 }
 0x136   :  { %v201_v6 = vadd.f32 %v200_v4, %v881_v54  ;;  %v202_v7 = vpop.f32.mrb[5].mxu0 }
 0x137   :  { %v203_v8 = vadd.f32 %v202_v7, %v883_v55  ;;  %423 = vmatprep.mubr.f32.mxu1 %v286_v3 }
 0x138   :  { %424 = vmatmul.mubr.f32.gmra.mrb[2].mxu1 %v285_v5  ;;  %v287_v11 = vmax.f32 %v201_v6, 0.0 }
 0x139   :  { %v288_v9 = vmax.f32 %v203_v8, 0.0  ;;  %v206_v10 = vpop.f32.mrb[6].mxu0 }
 0x13a   :  { %v207_v12 = vadd.f32 %v206_v10, %v881_v54  ;;  %v208_v13 = vpop.f32.mrb[7].mxu0 }
 0x13b   :  { %v209_v14 = vadd.f32 %v208_v13, %v883_v55  ;;  %428 = vmatprep.mubr.f32.mxu1 %v288_v9 }
 0x13c   :  { %429 = vmatmul.mubr.f32.gmra.mrb[4].mxu1 %v287_v11  ;;  %v289_v17 = vmax.f32 %v207_v12, 0.0 }
 0x13d   :  { %v290_v15 = vmax.f32 %v209_v14, 0.0  ;;  %v212_v16 = vpop.f32.mrb[8].mxu0 }
 0x13e   :  { %v213_v18 = vadd.f32 %v212_v16, %v881_v54  ;;  %v214_v19 = vpop.f32.mrb[9].mxu0 }
 0x13f   :  { %v215_v20 = vadd.f32 %v214_v19, %v883_v55  ;;  %433 = vmatprep.mubr.f32.mxu1 %v290_v15 }
 0x140   :  { %434 = vmatmul.mubr.f32.gmra.mrb[6].mxu1 %v289_v17  ;;  %v291_v23 = vmax.f32 %v213_v18, 0.0 }
 0x141   :  { %v292_v21 = vmax.f32 %v215_v20, 0.0  ;;  %v218_v22 = vpop.f32.mrb[10].mxu0 }
 0x142   :  { %v219_v24 = vadd.f32 %v218_v22, %v881_v54  ;;  %v220_v25 = vpop.f32.mrb[11].mxu0 }
 0x143   :  { %v221_v26 = vadd.f32 %v220_v25, %v883_v55  ;;  %438 = vmatprep.mubr.f32.mxu1 %v292_v21 }
 0x144   :  { %439 = vmatmul.mubr.f32.gmra.mrb[8].mxu1 %v291_v23  ;;  %v293_v29 = vmax.f32 %v219_v24, 0.0 }
 0x145   :  { %v294_v27 = vmax.f32 %v221_v26, 0.0  ;;  %v224_v28 = vpop.f32.mrb[12].mxu0 }
 0x146   :  { %v225_v30 = vadd.f32 %v224_v28, %v881_v54  ;;  %v226_v31 = vpop.f32.mrb[13].mxu0  ;;  %v920_v28 = vld [vmem:[%s957_s4] ss:$0 sm:$0xff]  ;;  %s789_s4 = smov [#allocation8]  }
 0x147   :  { %v227_v32 = vadd.f32 %v226_v31, %v883_v55  ;;  %443 = vmatprep.mubr.f32.mxu1 %v294_v27  ;;  %s520_s8 = sshll.u32 %s789_s4, 4  ;;  %s521_s8 = int_to_ptr.vmem [resolvable:$true] %s520_s8 }
 0x148   :  { %444 = vmatmul.mubr.f32.gmra.mrb[10].mxu1 %v293_v29  ;;  %v295_v35 = vmax.f32 %v225_v30, 0.0  ;;  %s753_s9 = scalar_lea.vmem %s521_s8, 2048  ;;  %p758_p11 = scmp.lt.s32.totalorder %s521_s8, %s521_s8 }
 0x149   :  { %v296_v33 = vmax.f32 %v227_v32, 0.0  ;;  %v230_v34 = vpop.f32.mrb[14].mxu0  ;;  %p754_p10 = scmp.ne.s32.totalorder %s521_s8, %s753_s9  ;;  %p759_p12 = scmp.lt.s32.totalorder %s753_s9, %s753_s9 }
 0x14a   :  { %v231_v36 = vadd.f32 %v230_v34, %v881_v54  ;;  %v232_v37 = vpop.f32.mrb[15].mxu0 }
 0x14b   :  { %v233_v38 = vadd.f32 %v232_v37, %v883_v55  ;;  %448 = vmatprep.mubr.f32.mxu1 %v296_v33  ;;  %p760_p13 = por %p759_p12, %p758_p11 }
 0x14c   :  { %449 = vmatmul.mubr.f32.gmra.mrb[12].mxu1 %v295_v35  ;;  %v297_v41 = vmax.f32 %v231_v36, 0.0 }
 0x14d   :  { %v298_v39 = vmax.f32 %v233_v38, 0.0  ;;  %v236_v40 = vpop.f32.mrb[16].mxu0  ;;  %p761_p0 = pnand %p760_p13, %p754_p10 }
 0x14e   :  { %v237_v42 = vadd.f32 %v236_v40, %v881_v54  ;;  %v238_v43 = vpop.f32.mrb[17].mxu0 }
 0x14f   :  { %v239_v44 = vadd.f32 %v238_v43, %v883_v55  ;;  %453 = vmatprep.mubr.f32.mxu1 %v298_v39 }
 0x150   :  { %454 = vmatmul.mubr.f32.gmra.mrb[14].mxu1 %v297_v41  ;;  %v299_v47 = vmax.f32 %v237_v42, 0.0 }
 0x151   :  { %v300_v45 = vmax.f32 %v239_v44, 0.0  ;;  %v242_v46 = vpop.f32.mrb[18].mxu0 }
 0x152   :  { %v243_v48 = vadd.f32 %v242_v46, %v881_v54  ;;  %v244_v49 = vpop.f32.mrb[19].mxu0 }
 0x153   :  { %v245_v50 = vadd.f32 %v244_v49, %v883_v55  ;;  %458 = vmatprep.mubr.f32.mxu1 %v300_v45 }
 0x154   :  { %459 = vmatmul.mubr.f32.gmra.mrb[16].mxu1 %v299_v47  ;;  %v301_v0 = vmax.f32 %v243_v48, 0.0 }
 0x155   :  { %v302_v51 = vmax.f32 %v245_v50, 0.0  ;;  %v248_v52 = vpop.f32.mrb[20].mxu0 }
 0x156   :  { %v249_v53 = vadd.f32 %v248_v52, %v881_v54  ;;  %v250_v56 = vpop.f32.mrb[21].mxu0 }
 0x157   :  { %v251_v57 = vadd.f32 %v250_v56, %v883_v55  ;;  %463 = vmatprep.mubr.f32.mxu1 %v302_v51 }
 0x158   :  { %464 = vmatmul.mubr.f32.gmra.mrb[18].mxu1 %v301_v0  ;;  %v303_v60 = vmax.f32 %v249_v53, 0.0 }
 0x159   :  { %v304_v58 = vmax.f32 %v251_v57, 0.0  ;;  %v254_v59 = vpop.f32.mrb[22].mxu0 }
 0x15a   :  { %v255_v61 = vadd.f32 %v254_v59, %v881_v54  ;;  %v256_v62 = vpop.f32.mrb[23].mxu0 }
 0x15b   :  { %v257_v63 = vadd.f32 %v256_v62, %v883_v55  ;;  %468 = vmatprep.mubr.f32.mxu1 %v304_v58 }
 0x15c   :  { %469 = vmatmul.mubr.f32.gmra.mrb[20].mxu1 %v303_v60  ;;  %v305_v3 = vmax.f32 %v255_v61, 0.0 }
 0x15d   :  { %v306_v1 = vmax.f32 %v257_v63, 0.0  ;;  %v260_v2 = vpop.f32.mrb[24].mxu0 }
 0x15e   :  { %v261_v4 = vadd.f32 %v260_v2, %v881_v54  ;;  %v262_v5 = vpop.f32.mrb[25].mxu0 }
 0x15f   :  { %v263_v6 = vadd.f32 %v262_v5, %v883_v55  ;;  %473 = vmatprep.mubr.f32.mxu1 %v306_v1 }
 0x160   :  { %474 = vmatmul.mubr.f32.gmra.mrb[22].mxu1 %v305_v3  ;;  %v307_v9 = vmax.f32 %v261_v4, 0.0 }
 0x161   :  { %v308_v7 = vmax.f32 %v263_v6, 0.0  ;;  %v266_v8 = vpop.f32.mrb[26].mxu0 }
 0x162   :  { %v267_v10 = vadd.f32 %v266_v8, %v881_v54  ;;  %v268_v11 = vpop.f32.mrb[27].mxu0 }
 0x163   :  { %v269_v12 = vadd.f32 %v268_v11, %v883_v55  ;;  %478 = vmatprep.mubr.f32.mxu1 %v308_v7 }
 0x164   :  { %479 = vmatmul.mubr.f32.gmra.mrb[24].mxu1 %v307_v9  ;;  %v309_v15 = vmax.f32 %v267_v10, 0.0 }
 0x165   :  { %v310_v13 = vmax.f32 %v269_v12, 0.0  ;;  %v272_v14 = vpop.f32.mrb[28].mxu0 }
 0x166   :  { %v273_v16 = vadd.f32 %v272_v14, %v881_v54  ;;  %v274_v17 = vpop.f32.mrb[29].mxu0 }
 0x167   :  { %v275_v18 = vadd.f32 %v274_v17, %v883_v55  ;;  %483 = vmatprep.mubr.f32.mxu1 %v310_v13 }
 0x168   :  { %484 = vmatmul.mubr.f32.gmra.mrb[26].mxu1 %v309_v15  ;;  %v311_v21 = vmax.f32 %v273_v16, 0.0 }
 0x169   :  { %v312_v19 = vmax.f32 %v275_v18, 0.0  ;;  %v278_v20 = vpop.f32.mrb[30].mxu0 }
 0x16a   :  { %v279_v22 = vadd.f32 %v278_v20, %v881_v54  ;;  %v280_v23 = vpop.f32.mrb[31].mxu0 }
 0x16b   :  { %v281_v24 = vadd.f32 %v280_v23, %v883_v55  ;;  %488 = vmatprep.mubr.f32.mxu1 %v312_v19 }
 0x16c   :  { %489 = vmatmul.mubr.f32.gmra.mrb[28].mxu1 %v311_v21  ;;  %v313_v26 = vmax.f32 %v279_v22, 0.0 }
 0x16d   :  { %v314_v25 = vmax.f32 %v281_v24, 0.0 }
 0x16f   :  { %493 = vmatprep.mubr.f32.mxu1 %v314_v25 }
 0x170   :  { %494 = vmatmul.mubr.f32.gmra.mrb[30].mxu1 %v313_v26 }
 0x207   :  { %v566_v27 = vpop.f32.mrb[0].mxu1 }
 0x208   :  { %v567_v29 = vpop.f32.mrb[1].mxu1 }
 0x209   :  { %v568_v30 = vadd.f32 %v567_v29, %v566_v27 }
 0x20b   :  { %v421_v31 = vadd.f32 %v568_v30, %v920_v28  ;;  %v569_v54 = vpop.f32.mrb[2].mxu1 }
 0x20c   :  { %v570_v32 = vpop.f32.mrb[3].mxu1 }
 0x20d   :  { %499 = vst [vmem:[#allocation8] sm:$0xff] %v421_v31  ;;  %v571_v55 = vadd.f32 %v570_v32, %v569_v54 }
 0x20f   :  { %v426_v33 = vadd.f32 %v571_v55, %v920_v28  ;;  %v572_v34 = vpop.f32.mrb[4].mxu1 }
 0x210   :  { %v573_v35 = vpop.f32.mrb[5].mxu1 }
 0x211   :  { %500 = vst [vmem:[#allocation8 + $0x8] sm:$0xff] %v426_v33  ;;  %v574_v36 = vadd.f32 %v573_v35, %v572_v34 }
 0x213   :  { %v431_v37 = vadd.f32 %v574_v36, %v920_v28  ;;  %v575_v38 = vpop.f32.mrb[6].mxu1 }
 0x214   :  { %v576_v39 = vpop.f32.mrb[7].mxu1 }
 0x215   :  { %501 = vst [vmem:[#allocation8 + $0x10] sm:$0xff] %v431_v37  ;;  %v577_v40 = vadd.f32 %v576_v39, %v575_v38 }
 0x217   :  { %v436_v41 = vadd.f32 %v577_v40, %v920_v28  ;;  %v578_v42 = vpop.f32.mrb[8].mxu1 }
 0x218   :  { %v579_v43 = vpop.f32.mrb[9].mxu1 }
 0x219   :  { %502 = vst [vmem:[#allocation8 + $0x18] sm:$0xff] %v436_v41  ;;  %v580_v44 = vadd.f32 %v579_v43, %v578_v42 }
 0x21b   :  { %v441_v45 = vadd.f32 %v580_v44, %v920_v28  ;;  %v581_v46 = vpop.f32.mrb[10].mxu1 }
 0x21c   :  { %v582_v47 = vpop.f32.mrb[11].mxu1 }
 0x21d   :  { %503 = vst [vmem:[#allocation8 + $0x20] sm:$0xff] %v441_v45  ;;  %v583_v48 = vadd.f32 %v582_v47, %v581_v46 }
 0x21f   :  { %v446_v49 = vadd.f32 %v583_v48, %v920_v28  ;;  %v584_v50 = vpop.f32.mrb[12].mxu1 }
 0x220   :  { %v585_v51 = vpop.f32.mrb[13].mxu1 }
 0x221   :  { %504 = vst [vmem:[#allocation8 + $0x28] sm:$0xff] %v446_v49  ;;  %v586_v52 = vadd.f32 %v585_v51, %v584_v50 }
 0x223   :  { %v451_v0 = vadd.f32 %v586_v52, %v920_v28  ;;  %v587_v53 = vpop.f32.mrb[14].mxu1 }
 0x224   :  { %v588_v56 = vpop.f32.mrb[15].mxu1 }
 0x225   :  { %505 = vst [vmem:[#allocation8 + $0x30] sm:$0xff] %v451_v0  ;;  %v589_v57 = vadd.f32 %v588_v56, %v587_v53 }
 0x227   :  { %v456_v58 = vadd.f32 %v589_v57, %v920_v28  ;;  %v590_v59 = vpop.f32.mrb[16].mxu1 }
 0x228   :  { %v591_v60 = vpop.f32.mrb[17].mxu1 }
 0x229   :  { %506 = vst [vmem:[#allocation8 + $0x38] sm:$0xff] %v456_v58  ;;  %v592_v61 = vadd.f32 %v591_v60, %v590_v59 }
 0x22b   :  { %v461_v62 = vadd.f32 %v592_v61, %v920_v28  ;;  %v593_v63 = vpop.f32.mrb[18].mxu1 }
 0x22c   :  { %v594_v1 = vpop.f32.mrb[19].mxu1 }
 0x22d   :  { %507 = vst [vmem:[#allocation8 + $0x40] sm:$0xff] %v461_v62  ;;  %v595_v2 = vadd.f32 %v594_v1, %v593_v63 }
 0x22f   :  { %v466_v3 = vadd.f32 %v595_v2, %v920_v28  ;;  %v596_v4 = vpop.f32.mrb[20].mxu1 }
 0x230   :  { %v597_v5 = vpop.f32.mrb[21].mxu1 }
 0x231   :  { %508 = vst [vmem:[#allocation8 + $0x48] sm:$0xff] %v466_v3  ;;  %v598_v6 = vadd.f32 %v597_v5, %v596_v4 }
 0x233   :  { %v471_v7 = vadd.f32 %v598_v6, %v920_v28  ;;  %v599_v8 = vpop.f32.mrb[22].mxu1 }
 0x234   :  { %v600_v9 = vpop.f32.mrb[23].mxu1 }
 0x235   :  { %509 = vst [vmem:[#allocation8 + $0x50] sm:$0xff] %v471_v7  ;;  %v601_v10 = vadd.f32 %v600_v9, %v599_v8 }
 0x237   :  { %v476_v11 = vadd.f32 %v601_v10, %v920_v28  ;;  %v602_v12 = vpop.f32.mrb[24].mxu1 }
 0x238   :  { %v603_v13 = vpop.f32.mrb[25].mxu1 }
 0x239   :  { %510 = vst [vmem:[#allocation8 + $0x58] sm:$0xff] %v476_v11  ;;  %v604_v14 = vadd.f32 %v603_v13, %v602_v12 }
 0x23b   :  { %v481_v15 = vadd.f32 %v604_v14, %v920_v28  ;;  %v605_v16 = vpop.f32.mrb[26].mxu1 }
 0x23c   :  { %v606_v17 = vpop.f32.mrb[27].mxu1 }
 0x23d   :  { %511 = vst [vmem:[#allocation8 + $0x60] sm:$0xff] %v481_v15  ;;  %v607_v18 = vadd.f32 %v606_v17, %v605_v16 }
 0x23f   :  { %v486_v19 = vadd.f32 %v607_v18, %v920_v28  ;;  %v608_v20 = vpop.f32.mrb[28].mxu1 }
 0x240   :  { %v609_v21 = vpop.f32.mrb[29].mxu1 }
 0x241   :  { %512 = vst [vmem:[#allocation8 + $0x68] sm:$0xff] %v486_v19  ;;  %v610_v22 = vadd.f32 %v609_v21, %v608_v20 }
 0x243   :  { %v491_v23 = vadd.f32 %v610_v22, %v920_v28  ;;  %v611_v24 = vpop.f32.mrb[30].mxu1 }
 0x244   :  { %v612_v25 = vpop.f32.mrb[31].mxu1 }
 0x245   :  { %513 = vst [vmem:[#allocation8 + $0x70] sm:$0xff] %v491_v23  ;;  %v613_v26 = vadd.f32 %v612_v25, %v611_v24 }
 0x247   :  { %v496_v27 = vadd.f32 %v613_v26, %v920_v28 }
 0x249   :  { %514 = vst [vmem:[#allocation8 + $0x78] sm:$0xff] %v496_v27 }
 0x24a   :  { %764 = shalt.err (!%p761_p0)
}
 0x24b   :  { %s765_s12 = scalar_lea.hbm %s958_s5, 2048 }
 0x24c   :  { %p766_p1 = scmp.ne.s32.totalorder %s958_s5, %s765_s12  ;;  %p769_p2 = scmp.lt.u32.totalorder %s765_s12, %s958_s5 }
 0x24e   :  { %p771_p3 = pnand %p769_p2, %p766_p1 }
 0x250   :  { %774 = shalt.err (!%p771_p3)
}
 0x251   :  { %526 = dma.vmem_to_hbm [thread:$0]  %s521_s8, 2048, %s958_s5, [#allocation4], %s785_s1, %s785_s1, %s786_s17  }
 0x252   :  { %779 = dma.done.wait [#allocation4], 2048  }
 0x253   :  { %780 = vsyncadd [#allocation4], 4294965248 }
 0x254   :  { %530 = vsyncpa [#allocation3], 1 }
 0x255   :  { %531 = vsyncpa [#allocation6], 1 }
 0x256   :  { %532 = vsyncpa [#allocation4], 1 }

// kernel: tpu_custom_call.1
= control target key start
LH: loop header
LB: loop body
LE: loop exit
PB: predicated region body
PF: predicated region fallthrough
CT: control target
= control target key end

     0   :  { %10 = vsyncpa [#allocation3], 0  ;;  %s953_s0 = inlined_call_operand.hbm [shape: f32[128,128], index: 0, kind: input, shape index: {}]   ;;  %s954_s1 = inlined_call_operand.hbm [shape: f32[128,256], index: 1, kind: input, shape index: {}]   ;;  %s955_s2 = inlined_call_operand.vmem [shape: f32[1,256], index: 2, kind: input, shape index: {}]   ;;  %s956_s3 = inlined_call_operand.hbm [shape: f32[256,128], index: 3, kind: input, shape index: {}]   ;;  %s957_s4 = inlined_call_operand.vmem [shape: f32[1,128], index: 4, kind: input, shape index: {}]   ;;  %s958_s5 = inlined_call_operand.hbm [shape: f32[128,128], index: 5, kind: output, shape index: {}]  }
   0x1   :  { %11 = vsyncpa [#allocation6], 0 }
   0x2   :  { %12 = vsyncpa [#allocation4], 0  ;;  %s781_s18 = smov [#allocation5]   ;;  %s687_s22 = scalar_lea.hbm %s954_s1, 4096 }
   0x3   :  { %s30_s19 = sshll.u32 %s781_s18, 4  ;;  %p688_p0 = scmp.ne.s32.totalorder %s954_s1, %s687_s22  ;;  %s31_s19 = int_to_ptr.vmem [resolvable:$true] %s30_s19 }
   0x4   :  { %p691_p1 = scmp.lt.u32.totalorder %s687_s22, %s954_s1 }
   0x6   :  { %p693_p2 = pnand %p691_p1, %p688_p0 }
   0x8   :  { %696 = shalt.err (!%p693_p2)
}
   0x9   :  { %s697_s27 = scalar_lea.vmem %s31_s19, 4096  ;;  %p702_p4 = scmp.lt.s32.totalorder %s31_s19, %s31_s19 }
   0xa   :  { %p698_p3 = scmp.ne.s32.totalorder %s31_s19, %s697_s27  ;;  %p703_p5 = scmp.lt.s32.totalorder %s697_s27, %s697_s27 }
   0xc   :  { %p704_p6 = por %p703_p5, %p702_p4 }
   0xe   :  { %p705_p7 = pnand %p704_p6, %p698_p3 }
  0x10   :  { %708 = shalt.err (!%p705_p7)
}
  0x11   :  { %s782_s28 = smov 256   ;;  %s783_s29 = smov 16  }
  0x12   :  { %36 = dma.hbm_to_vmem [thread:$0]  %s954_s1, 4096, %s31_s19, [#allocation6], %s782_s28, %s782_s28, %s783_s29  }
  0x13   :  { %s784_s7 = smov [#allocation2]   ;;  %s709_s11 = scalar_lea.hbm %s953_s0, 2048 }
  0x14   :  { %s18_s8 = sshll.u32 %s784_s7, 4  ;;  %p710_p8 = scmp.ne.s32.totalorder %s953_s0, %s709_s11  ;;  %s19_s8 = int_to_ptr.vmem [resolvable:$true] %s18_s8 }
  0x15   :  { %p713_p9 = scmp.lt.u32.totalorder %s709_s11, %s953_s0 }
  0x17   :  { %p715_p10 = pnand %p713_p9, %p710_p8 }
  0x19   :  { %718 = shalt.err (!%p715_p10)
}
  0x1a   :  { %s719_s16 = scalar_lea.vmem %s19_s8, 2048  ;;  %p724_p12 = scmp.lt.s32.totalorder %s19_s8, %s19_s8 }
  0x1b   :  { %p720_p11 = scmp.ne.s32.totalorder %s19_s8, %s719_s16  ;;  %p725_p13 = scmp.lt.s32.totalorder %s719_s16, %s719_s16 }
  0x1d   :  { %p726_p0 = por %p725_p13, %p724_p12 }
  0x1f   :  { %p727_p1 = pnand %p726_p0, %p720_p11 }
  0x21   :  { %730 = shalt.err (!%p727_p1)
}
  0x22   :  { %s785_s1 = smov 128   ;;  %s786_s17 = smov 8  }
  0x23   :  { %24 = dma.hbm_to_vmem [thread:$0]  %s953_s0, 2048, %s19_s8, [#allocation3], %s785_s1, %s785_s1, %s786_s17  }
  0x24   :  { %s787_s20 = smov [#allocation7]   ;;  %s731_s24 = scalar_lea.hbm %s956_s3, 4096 }
  0x25   :  { %s44_s21 = sshll.u32 %s787_s20, 4  ;;  %p732_p2 = scmp.ne.s32.totalorder %s956_s3, %s731_s24  ;;  %s45_s21 = int_to_ptr.vmem [resolvable:$true] %s44_s21 }
  0x26   :  { %p735_p3 = scmp.lt.u32.totalorder %s731_s24, %s956_s3 }
  0x28   :  { %p737_p4 = pnand %p735_p3, %p732_p2 }
  0x2a   :  { %740 = shalt.err (!%p737_p4)
}
  0x2b   :  { %s741_s29 = scalar_lea.vmem %s45_s21, 4096  ;;  %p746_p6 = scmp.lt.s32.totalorder %s45_s21, %s45_s21 }
  0x2c   :  { %p742_p5 = scmp.ne.s32.totalorder %s45_s21, %s741_s29  ;;  %p747_p7 = scmp.lt.s32.totalorder %s741_s29, %s741_s29 }
  0x2e   :  { %p748_p8 = por %p747_p7, %p746_p6 }
  0x30   :  { %p749_p9 = pnand %p748_p8, %p742_p5 }
  0x32   :  { %752 = shalt.err (!%p749_p9)
}
  0x33   :  { %50 = dma.hbm_to_vmem [thread:$0]  %s956_s3, 4096, %s45_s21, [#allocation6], %s785_s1, %s785_s1, %s786_s17  }
  0x34   :  { %775 = dma.done.wait [#allocation3], 2048  }
  0x35   :  { %776 = vsyncadd [#allocation3], 4294965248 }
  0x36   :  { %777 = dma.done.wait [#allocation6], 8192  }
  0x37   :  { %778 = vsyncadd [#allocation6], 4294959104  ;;  %v788_v0 = vmov 0.0   ;;  %v79_v1 = vld [vmem:[#allocation5 + $0x8] sm:$0xff]  ;;  %v81_v2 = vld [vmem:[#allocation5 + $0x18] sm:$0xff] }
  0x38   :  { %186 = vmatprep.mubr.f32.mxu0 %v788_v0  ;;  %v78_v3 = vld [vmem:[#allocation5] sm:$0xff]  ;;  %v614_v4 = vpack.c.bf16 %v81_v2, %v79_v1  ;;  %v80_v5 = vld [vmem:[#allocation5 + $0x10] sm:$0xff]  ;;  %v83_v6 = vld [vmem:[#allocation5 + $0x28] sm:$0xff] }
  0x39   :  { %v85_v7 = vld [vmem:[#allocation5 + $0x38] sm:$0xff]  ;;  %v616_v8 = vpack.c.bf16 %v80_v5, %v78_v3  ;;  %v82_v10 = vld [vmem:[#allocation5 + $0x20] sm:$0xff]  ;;  %v84_v11 = vld [vmem:[#allocation5 + $0x30] sm:$0xff] }
  0x3a   :  { %v618_v9 = vpack.c.bf16 %v85_v7, %v83_v6  ;;  %v87_v12 = vld [vmem:[#allocation5 + $0x48] sm:$0xff]  ;;  %615 = vmatprep.subr.bf16.mxu0 %v614_v4  ;;  %v89_v13 = vld [vmem:[#allocation5 + $0x58] sm:$0xff]  ;;  %v620_v14 = vpack.c.bf16 %v84_v11, %v82_v10  ;;  %v86_v16 = vld [vmem:[#allocation5 + $0x40] sm:$0xff] }
  0x3b   :  { %617 = vmatpush1.bf16.msra.mxu0 %v616_v8  ;;  %v622_v15 = vpack.c.bf16 %v89_v13, %v87_v12  ;;  %v88_v17 = vld [vmem:[#allocation5 + $0x50] sm:$0xff]  ;;  %v91_v18 = vld [vmem:[#allocation5 + $0x68] sm:$0xff]  ;;  %v93_v19 = vld [vmem:[#allocation5 + $0x78] sm:$0xff] }
  0x3c   :  { %619 = vmatprep.subr.bf16.mxu0 %v618_v9  ;;  %v624_v20 = vpack.c.bf16 %v88_v17, %v86_v16  ;;  %v626_v21 = vpack.c.bf16 %v93_v19, %v91_v18  ;;  %v90_v22 = vld [vmem:[#allocation5 + $0x60] sm:$0xff]  ;;  %v92_v23 = vld [vmem:[#allocation5 + $0x70] sm:$0xff]  ;;  %v95_v24 = vld [vmem:[#allocation5 + $0x88] sm:$0xff] }
  0x3d   :  { %v97_v25 = vld [vmem:[#allocation5 + $0x98] sm:$0xff]  ;;  %v628_v26 = vpack.c.bf16 %v92_v23, %v90_v22  ;;  %v94_v28 = vld [vmem:[#allocation5 + $0x80] sm:$0xff]  ;;  %v96_v29 = vld [vmem:[#allocation5 + $0x90] sm:$0xff] }
  0x3e   :  { %v630_v27 = vpack.c.bf16 %v97_v25, %v95_v24  ;;  %v99_v30 = vld [vmem:[#allocation5 + $0xa8] sm:$0xff]  ;;  %v101_v31 = vld [vmem:[#allocation5 + $0xb8] sm:$0xff]  ;;  %v98_v32 = vld [vmem:[#allocation5 + $0xa0] sm:$0xff]  ;;  %v632_v34 = vpack.c.bf16 %v96_v29, %v94_v28 }
  0x3f   :  { %621 = vmatpush1.bf16.msra.mxu0 %v620_v14  ;;  %v100_v33 = vld [vmem:[#allocation5 + $0xb0] sm:$0xff]  ;;  %v103_v35 = vld [vmem:[#allocation5 + $0xc8] sm:$0xff]  ;;  %v105_v36 = vld [vmem:[#allocation5 + $0xd8] sm:$0xff]  ;;  %v634_v40 = vpack.c.bf16 %v101_v31, %v99_v30 }
  0x40   :  { %623 = vmatprep.subr.bf16.mxu0 %v622_v15  ;;  %v331_v37 = vld [vmem:[#allocation7 + $0x80] sm:$0xff]  ;;  %v332_v38 = vld [vmem:[#allocation7 + $0x88] sm:$0xff]  ;;  %v333_v43 = vld [vmem:[#allocation7 + $0x90] sm:$0xff]  ;;  %v636_v51 = vpack.c.bf16 %v100_v33, %v98_v32  ;;  %v638_v55 = vpack.c.bf16 %v105_v36, %v103_v35 }
  0x41   :  { %v315_v39 = vld [vmem:[#allocation7] sm:$0xff]  ;;  %v646_v41 = vpack.c.bf16 %v332_v38, %v331_v37  ;;  %v316_v42 = vld [vmem:[#allocation7 + $0x8] sm:$0xff]  ;;  %v334_v44 = vld [vmem:[#allocation7 + $0x98] sm:$0xff] }
  0x42   :  { %v648_v45 = vpack.c.bf16 %v316_v42, %v315_v39  ;;  %v650_v46 = vpack.c.bf16 %v334_v44, %v333_v43  ;;  %v317_v47 = vld [vmem:[#allocation7 + $0x10] sm:$0xff]  ;;  %v318_v48 = vld [vmem:[#allocation7 + $0x18] sm:$0xff]  ;;  %v335_v49 = vld [vmem:[#allocation7 + $0xa0] sm:$0xff] }
  0x43   :  { %625 = vmatpush1.bf16.msra.mxu0 %v624_v20  ;;  %647 = vmatprep.subr.bf16.mxu1 %v646_v41  ;;  %v336_v50 = vld [vmem:[#allocation7 + $0xa8] sm:$0xff]  ;;  %v102_v52 = vld [vmem:[#allocation5 + $0xc0] sm:$0xff]  ;;  %v104_v53 = vld [vmem:[#allocation5 + $0xd0] sm:$0xff]  ;;  %v652_v54 = vpack.c.bf16 %v318_v48, %v317_v47 }
  0x44   :  { %627 = vmatprep.subr.bf16.mxu0 %v626_v21  ;;  %649 = vmatpush3.bf16.msra.mxu1 %v648_v45  ;;  %v107_v56 = vld [vmem:[#allocation5 + $0xe8] sm:$0xff]  ;;  %v654_v57 = vpack.c.bf16 %v336_v50, %v335_v49  ;;  %v319_v58 = vld [vmem:[#allocation7 + $0x20] sm:$0xff]  ;;  %v109_v60 = vld [vmem:[#allocation5 + $0xf8] sm:$0xff]  ;;  %v640_v63 = vpack.c.bf16 %v104_v53, %v102_v52  ;;  %v112_v50 = vlaneseq }
  0x45   :  { %651 = vmatprep.subr.bf16.mxu1 %v650_v46  ;;  %v320_v59 = vld [vmem:[#allocation7 + $0x28] sm:$0xff]  ;;  %v337_v61 = vld [vmem:[#allocation7 + $0xb0] sm:$0xff]  ;;  %v338_v62 = vld [vmem:[#allocation7 + $0xb8] sm:$0xff]  ;;  %v642_v3 = vpack.c.bf16 %v109_v60, %v107_v56 }
  0x46   :  { %v106_v1 = vld [vmem:[#allocation5 + $0xe0] sm:$0xff]  ;;  %v656_v2 = vpack.c.bf16 %v320_v59, %v319_v58  ;;  %v108_v4 = vld [vmem:[#allocation5 + $0xf0] sm:$0xff]  ;;  %v658_v5 = vpack.c.bf16 %v338_v62, %v337_v61  ;;  %v322_v7 = vld [vmem:[#allocation7 + $0x38] sm:$0xff] }
  0x47   :  { %629 = vmatpush1.bf16.msra.mxu0 %v628_v26  ;;  %v321_v6 = vld [vmem:[#allocation7 + $0x30] sm:$0xff]  ;;  %v339_v8 = vld [vmem:[#allocation7 + $0xc0] sm:$0xff]  ;;  %v340_v9 = vld [vmem:[#allocation7 + $0xc8] sm:$0xff]  ;;  %v644_v10 = vpack.c.bf16 %v108_v4, %v106_v1 }
  0x48   :  { %631 = vmatprep.subr.bf16.mxu0 %v630_v27  ;;  %653 = vmatpush3.bf16.msra.mxu1 %v652_v54  ;;  %v660_v11 = vpack.c.bf16 %v322_v7, %v321_v6  ;;  %v662_v12 = vpack.c.bf16 %v340_v9, %v339_v8  ;;  %v323_v13 = vld [vmem:[#allocation7 + $0x40] sm:$0xff]  ;;  %v324_v14 = vld [vmem:[#allocation7 + $0x48] sm:$0xff]  ;;  %v341_v15 = vld [vmem:[#allocation7 + $0xd0] sm:$0xff] }
  0x49   :  { %655 = vmatprep.subr.bf16.mxu1 %v654_v57  ;;  %v342_v16 = vld [vmem:[#allocation7 + $0xd8] sm:$0xff]  ;;  %v62_v17 = vld [vmem:[#allocation2] sm:$0xff]  ;;  %v664_v18 = vpack.c.bf16 %v324_v14, %v323_v13  ;;  %v325_v20 = vld [vmem:[#allocation7 + $0x50] sm:$0xff] }
  0x4a   :  { %v666_v19 = vpack.c.bf16 %v342_v16, %v341_v15  ;;  %v326_v21 = vld [vmem:[#allocation7 + $0x58] sm:$0xff]  ;;  %v343_v22 = vld [vmem:[#allocation7 + $0xe0] sm:$0xff]  ;;  %v344_v23 = vld [vmem:[#allocation7 + $0xe8] sm:$0xff] }
  0x4b   :  { %633 = vmatpush1.bf16.msra.mxu0 %v632_v34  ;;  %v63_v24 = vld [vmem:[#allocation2 + $0x8] sm:$0xff]  ;;  %v668_v25 = vpack.c.bf16 %v326_v21, %v325_v20  ;;  %v670_v26 = vpack.c.bf16 %v344_v23, %v343_v22  ;;  %v64_v27 = vld [vmem:[#allocation2 + $0x10] sm:$0xff]  ;;  %v65_v28 = vld [vmem:[#allocation2 + $0x18] sm:$0xff] }
  0x4c   :  { %635 = vmatprep.subr.bf16.mxu0 %v634_v40  ;;  %657 = vmatpush3.bf16.msra.mxu1 %v656_v2  ;;  %v66_v29 = vld [vmem:[#allocation2 + $0x20] sm:$0xff]  ;;  %v67_v30 = vld [vmem:[#allocation2 + $0x28] sm:$0xff]  ;;  %v68_v31 = vld [vmem:[#allocation2 + $0x30] sm:$0xff] }
  0x4d   :  { %659 = vmatprep.subr.bf16.mxu1 %v658_v5  ;;  %v69_v32 = vld [vmem:[#allocation2 + $0x38] sm:$0xff]  ;;  %v70_v33 = vld [vmem:[#allocation2 + $0x40] sm:$0xff]  ;;  %v71_v34 = vld [vmem:[#allocation2 + $0x48] sm:$0xff] }
  0x4e   :  { %v72_v35 = vld [vmem:[#allocation2 + $0x50] sm:$0xff]  ;;  %v73_v36 = vld [vmem:[#allocation2 + $0x58] sm:$0xff]  ;;  %v74_v37 = vld [vmem:[#allocation2 + $0x60] sm:$0xff] }
  0x4f   :  { %637 = vmatpush1.bf16.msra.mxu0 %v636_v51  ;;  %v75_v38 = vld [vmem:[#allocation2 + $0x68] sm:$0xff]  ;;  %v76_v39 = vld [vmem:[#allocation2 + $0x70] sm:$0xff]  ;;  %v77_v40 = vld [vmem:[#allocation2 + $0x78] sm:$0xff]  ;;  %v113_v51 = vshrl.u32 %v112_v50, 7 }
  0x50   :  { %639 = vmatprep.subr.bf16.mxu0 %v638_v55  ;;  %661 = vmatpush3.bf16.msra.mxu1 %v660_v11  ;;  %v327_v41 = vld [vmem:[#allocation7 + $0x60] sm:$0xff]  ;;  %v328_v42 = vld [vmem:[#allocation7 + $0x68] sm:$0xff]  ;;  %v345_v44 = vld [vmem:[#allocation7 + $0xf0] sm:$0xff] }
  0x51   :  { %663 = vmatprep.subr.bf16.mxu1 %v662_v12  ;;  %v672_v43 = vpack.c.bf16 %v328_v42, %v327_v41  ;;  %v346_v45 = vld [vmem:[#allocation7 + $0xf8] sm:$0xff]  ;;  %v329_v47 = vld [vmem:[#allocation7 + $0x70] sm:$0xff]  ;;  %v114_v52 = vsub.s32 0, %v113_v51  ;;  %v118_v53 = vsub.s32 1, %v113_v51 }
  0x52   :  { %v674_v46 = vpack.c.bf16 %v346_v45, %v345_v44  ;;  %v330_v48 = vld [vmem:[#allocation7 + $0x78] sm:$0xff] }
  0x53   :  { %641 = vmatpush1.bf16.msra.mxu0 %v640_v63  ;;  %v676_v49 = vpack.c.bf16 %v330_v48, %v329_v47 }
  0x54   :  { %643 = vmatprep.subr.bf16.mxu0 %v642_v3  ;;  %665 = vmatpush3.bf16.msra.mxu1 %v664_v18 }
  0x55   :  { %667 = vmatprep.subr.bf16.mxu1 %v666_v19 }
  0x57   :  { %645 = vmatpush1.bf16.msra.mxu0 %v644_v10 }
  0x58   :  { %669 = vmatpush3.bf16.msra.mxu1 %v668_v25 }
  0x59   :  { %671 = vmatprep.subr.bf16.mxu1 %v670_v26 }
  0x5a   :  { %187 = vmatmul.mubr.f32.vlgmr.msra.gmra.mrb[0].mxu0 %v62_v17 }
  0x5b   :  { %192 = vmatprep.mubr.f32.mxu0 %v788_v0 }
  0x5c   :  { %673 = vmatpush3.bf16.msra.mxu1 %v672_v43 }
  0x5d   :  { %675 = vmatprep.subr.bf16.mxu1 %v674_v46 }
  0x5e   :  { %193 = vmatmul.mubr.f32.gmra.mrb[2].mxu0 %v63_v24 }
  0x5f   :  { %198 = vmatprep.mubr.f32.mxu0 %v788_v0 }
  0x60   :  { %677 = vmatpush3.bf16.msra.mxu1 %v676_v49 }
  0x62   :  { %199 = vmatmul.mubr.f32.gmra.mrb[4].mxu0 %v64_v27 }
  0x63   :  { %204 = vmatprep.mubr.f32.mxu0 %v788_v0 }
  0x66   :  { %205 = vmatmul.mubr.f32.gmra.mrb[6].mxu0 %v65_v28 }
  0x67   :  { %210 = vmatprep.mubr.f32.mxu0 %v788_v0 }
  0x6a   :  { %211 = vmatmul.mubr.f32.gmra.mrb[8].mxu0 %v66_v29 }
  0x6b   :  { %216 = vmatprep.mubr.f32.mxu0 %v788_v0 }
  0x6e   :  { %217 = vmatmul.mubr.f32.gmra.mrb[10].mxu0 %v67_v30 }
  0x6f   :  { %222 = vmatprep.mubr.f32.mxu0 %v788_v0 }
  0x72   :  { %223 = vmatmul.mubr.f32.gmra.mrb[12].mxu0 %v68_v31 }
  0x73   :  { %228 = vmatprep.mubr.f32.mxu0 %v788_v0 }
  0x76   :  { %229 = vmatmul.mubr.f32.gmra.mrb[14].mxu0 %v69_v32 }
  0x77   :  { %234 = vmatprep.mubr.f32.mxu0 %v788_v0 }
  0x7a   :  { %235 = vmatmul.mubr.f32.gmra.mrb[16].mxu0 %v70_v33 }
  0x7b   :  { %240 = vmatprep.mubr.f32.mxu0 %v788_v0 }
  0x7e   :  { %241 = vmatmul.mubr.f32.gmra.mrb[18].mxu0 %v71_v34 }
  0x7f   :  { %246 = vmatprep.mubr.f32.mxu0 %v788_v0 }
  0x82   :  { %247 = vmatmul.mubr.f32.gmra.mrb[20].mxu0 %v72_v35 }
  0x83   :  { %252 = vmatprep.mubr.f32.mxu0 %v788_v0 }
  0x86   :  { %253 = vmatmul.mubr.f32.gmra.mrb[22].mxu0 %v73_v36 }
  0x87   :  { %258 = vmatprep.mubr.f32.mxu0 %v788_v0 }
  0x8a   :  { %259 = vmatmul.mubr.f32.gmra.mrb[24].mxu0 %v74_v37 }
  0x8b   :  { %264 = vmatprep.mubr.f32.mxu0 %v788_v0 }
  0x8e   :  { %265 = vmatmul.mubr.f32.gmra.mrb[26].mxu0 %v75_v38 }
  0x8f   :  { %270 = vmatprep.mubr.f32.mxu0 %v788_v0 }
  0x92   :  { %271 = vmatmul.mubr.f32.gmra.mrb[28].mxu0 %v76_v39 }
  0x93   :  { %276 = vmatprep.mubr.f32.mxu0 %v788_v0  ;;  %v110_v0 = vld [vmem:[%s955_s2] sm:$0x3] }
  0x94   :  { %v881_v54 = vrot.slane %v110_v0, %v114_v52  ;;  %v883_v55 = vrot.slane %v110_v0, %v118_v53 }
  0x96   :  { %277 = vmatmul.mubr.f32.gmra.mrb[30].mxu0 %v77_v40 }
 0x12d   :  { %v188_v56 = vpop.f32.mrb[0].mxu0 }
 0x12e   :  { %v189_v57 = vadd.f32 %v188_v56, %v881_v54  ;;  %v190_v58 = vpop.f32.mrb[1].mxu0 }
 0x12f   :  { %v191_v59 = vadd.f32 %v190_v58, %v883_v55 }
 0x130   :  { %v283_v62 = vmax.f32 %v189_v57, 0.0 }
 0x131   :  { %v194_v60 = vpop.f32.mrb[2].mxu0  ;;  %v284_v61 = vmax.f32 %v191_v59, 0.0 }
 0x132   :  { %v195_v63 = vadd.f32 %v194_v60, %v881_v54  ;;  %v196_v1 = vpop.f32.mrb[3].mxu0 }
 0x133   :  { %v197_v2 = vadd.f32 %v196_v1, %v883_v55  ;;  %418 = vmatprep.mubr.f32.mxu1 %v284_v61 }
 0x134   :  { %419 = vmatmul.mubr.f32.vlgmr.msra.gmra.mrb[0].mxu1 %v283_v62  ;;  %v285_v5 = vmax.f32 %v195_v63, 0.0 }
 0x135   :  { %v286_v3 = vmax.f32 %v197_v2, 0.0  ;;  %v200_v4 = vpop.f32.mrb[4].mxu0 }
 0x136   :  { %v201_v6 = vadd.f32 %v200_v4, %v881_v54  ;;  %v202_v7 = vpop.f32.mrb[5].mxu0 }
 0x137   :  { %v203_v8 = vadd.f32 %v202_v7, %v883_v55  ;;  %423 = vmatprep.mubr.f32.mxu1 %v286_v3 }
 0x138   :  { %424 = vmatmul.mubr.f32.gmra.mrb[2].mxu1 %v285_v5  ;;  %v287_v11 = vmax.f32 %v201_v6, 0.0 }
 0x139   :  { %v288_v9 = vmax.f32 %v203_v8, 0.0  ;;  %v206_v10 = vpop.f32.mrb[6].mxu0 }
 0x13a   :  { %v207_v12 = vadd.f32 %v206_v10, %v881_v54  ;;  %v208_v13 = vpop.f32.mrb[7].mxu0 }
 0x13b   :  { %v209_v14 = vadd.f32 %v208_v13, %v883_v55  ;;  %428 = vmatprep.mubr.f32.mxu1 %v288_v9 }
 0x13c   :  { %429 = vmatmul.mubr.f32.gmra.mrb[4].mxu1 %v287_v11  ;;  %v289_v17 = vmax.f32 %v207_v12, 0.0 }
 0x13d   :  { %v290_v15 = vmax.f32 %v209_v14, 0.0  ;;  %v212_v16 = vpop.f32.mrb[8].mxu0 }
 0x13e   :  { %v213_v18 = vadd.f32 %v212_v16, %v881_v54  ;;  %v214_v19 = vpop.f32.mrb[9].mxu0 }
 0x13f   :  { %v215_v20 = vadd.f32 %v214_v19, %v883_v55  ;;  %433 = vmatprep.mubr.f32.mxu1 %v290_v15 }
 0x140   :  { %434 = vmatmul.mubr.f32.gmra.mrb[6].mxu1 %v289_v17  ;;  %v291_v23 = vmax.f32 %v213_v18, 0.0 }
 0x141   :  { %v292_v21 = vmax.f32 %v215_v20, 0.0  ;;  %v218_v22 = vpop.f32.mrb[10].mxu0 }
 0x142   :  { %v219_v24 = vadd.f32 %v218_v22, %v881_v54  ;;  %v220_v25 = vpop.f32.mrb[11].mxu0 }
 0x143   :  { %v221_v26 = vadd.f32 %v220_v25, %v883_v55  ;;  %438 = vmatprep.mubr.f32.mxu1 %v292_v21 }
 0x144   :  { %439 = vmatmul.mubr.f32.gmra.mrb[8].mxu1 %v291_v23  ;;  %v293_v29 = vmax.f32 %v219_v24, 0.0 }
 0x145   :  { %v294_v27 = vmax.f32 %v221_v26, 0.0  ;;  %v224_v28 = vpop.f32.mrb[12].mxu0 }
 0x146   :  { %v225_v30 = vadd.f32 %v224_v28, %v881_v54  ;;  %v226_v31 = vpop.f32.mrb[13].mxu0  ;;  %v920_v28 = vld [vmem:[%s957_s4] ss:$0 sm:$0xff]  ;;  %s789_s4 = smov [#allocation8]  }
 0x147   :  { %v227_v32 = vadd.f32 %v226_v31, %v883_v55  ;;  %443 = vmatprep.mubr.f32.mxu1 %v294_v27  ;;  %s520_s8 = sshll.u32 %s789_s4, 4  ;;  %s521_s8 = int_to_ptr.vmem [resolvable:$true] %s520_s8 }
 0x148   :  { %444 = vmatmul.mubr.f32.gmra.mrb[10].mxu1 %v293_v29  ;;  %v295_v35 = vmax.f32 %v225_v30, 0.0  ;;  %s753_s9 = scalar_lea.vmem %s521_s8, 2048  ;;  %p758_p11 = scmp.lt.s32.totalorder %s521_s8, %s521_s8 }
 0x149   :  { %v296_v33 = vmax.f32 %v227_v32, 0.0  ;;  %v230_v34 = vpop.f32.mrb[14].mxu0  ;;  %p754_p10 = scmp.ne.s32.totalorder %s521_s8, %s753_s9  ;;  %p759_p12 = scmp.lt.s32.totalorder %s753_s9, %s753_s9 }
 0x14a   :  { %v231_v36 = vadd.f32 %v230_v34, %v881_v54  ;;  %v232_v37 = vpop.f32.mrb[15].mxu0 }
 0x14b   :  { %v233_v38 = vadd.f32 %v232_v37, %v883_v55  ;;  %448 = vmatprep.mubr.f32.mxu1 %v296_v33  ;;  %p760_p13 = por %p759_p12, %p758_p11 }
 0x14c   :  { %449 = vmatmul.mubr.f32.gmra.mrb[12].mxu1 %v295_v35  ;;  %v297_v41 = vmax.f32 %v231_v36, 0.0 }
 0x14d   :  { %v298_v39 = vmax.f32 %v233_v38, 0.0  ;;  %v236_v40 = vpop.f32.mrb[16].mxu0  ;;  %p761_p0 = pnand %p760_p13, %p754_p10 }
 0x14e   :  { %v237_v42 = vadd.f32 %v236_v40, %v881_v54  ;;  %v238_v43 = vpop.f32.mrb[17].mxu0 }
 0x14f   :  { %v239_v44 = vadd.f32 %v238_v43, %v883_v55  ;;  %453 = vmatprep.mubr.f32.mxu1 %v298_v39 }
 0x150   :  { %454 = vmatmul.mubr.f32.gmra.mrb[14].mxu1 %v297_v41  ;;  %v299_v47 = vmax.f32 %v237_v42, 0.0 }
 0x151   :  { %v300_v45 = vmax.f32 %v239_v44, 0.0  ;;  %v242_v46 = vpop.f32.mrb[18].mxu0 }
 0x152   :  { %v243_v48 = vadd.f32 %v242_v46, %v881_v54  ;;  %v244_v49 = vpop.f32.mrb[19].mxu0 }
 0x153   :  { %v245_v50 = vadd.f32 %v244_v49, %v883_v55  ;;  %458 = vmatprep.mubr.f32.mxu1 %v300_v45 }
 0x154   :  { %459 = vmatmul.mubr.f32.gmra.mrb[16].mxu1 %v299_v47  ;;  %v301_v0 = vmax.f32 %v243_v48, 0.0 }
 0x155   :  { %v302_v51 = vmax.f32 %v245_v50, 0.0  ;;  %v248_v52 = vpop.f32.mrb[20].mxu0 }
 0x156   :  { %v249_v53 = vadd.f32 %v248_v52, %v881_v54  ;;  %v250_v56 = vpop.f32.mrb[21].mxu0 }
 0x157   :  { %v251_v57 = vadd.f32 %v250_v56, %v883_v55  ;;  %463 = vmatprep.mubr.f32.mxu1 %v302_v51 }
 0x158   :  { %464 = vmatmul.mubr.f32.gmra.mrb[18].mxu1 %v301_v0  ;;  %v303_v60 = vmax.f32 %v249_v53, 0.0 }
 0x159   :  { %v304_v58 = vmax.f32 %v251_v57, 0.0  ;;  %v254_v59 = vpop.f32.mrb[22].mxu0 }
 0x15a   :  { %v255_v61 = vadd.f32 %v254_v59, %v881_v54  ;;  %v256_v62 = vpop.f32.mrb[23].mxu0 }
 0x15b   :  { %v257_v63 = vadd.f32 %v256_v62, %v883_v55  ;;  %468 = vmatprep.mubr.f32.mxu1 %v304_v58 }
 0x15c   :  { %469 = vmatmul.mubr.f32.gmra.mrb[20].mxu1 %v303_v60  ;;  %v305_v3 = vmax.f32 %v255_v61, 0.0 }
 0x15d   :  { %v306_v1 = vmax.f32 %v257_v63, 0.0  ;;  %v260_v2 = vpop.f32.mrb[24].mxu0 }
 0x15e   :  { %v261_v4 = vadd.f32 %v260_v2, %v881_v54  ;;  %v262_v5 = vpop.f32.mrb[25].mxu0 }
 0x15f   :  { %v263_v6 = vadd.f32 %v262_v5, %v883_v55  ;;  %473 = vmatprep.mubr.f32.mxu1 %v306_v1 }
 0x160   :  { %474 = vmatmul.mubr.f32.gmra.mrb[22].mxu1 %v305_v3  ;;  %v307_v9 = vmax.f32 %v261_v4, 0.0 }
 0x161   :  { %v308_v7 = vmax.f32 %v263_v6, 0.0  ;;  %v266_v8 = vpop.f32.mrb[26].mxu0 }
 0x162   :  { %v267_v10 = vadd.f32 %v266_v8, %v881_v54  ;;  %v268_v11 = vpop.f32.mrb[27].mxu0 }
 0x163   :  { %v269_v12 = vadd.f32 %v268_v11, %v883_v55  ;;  %478 = vmatprep.mubr.f32.mxu1 %v308_v7 }
 0x164   :  { %479 = vmatmul.mubr.f32.gmra.mrb[24].mxu1 %v307_v9  ;;  %v309_v15 = vmax.f32 %v267_v10, 0.0 }
 0x165   :  { %v310_v13 = vmax.f32 %v269_v12, 0.0  ;;  %v272_v14 = vpop.f32.mrb[28].mxu0 }
 0x166   :  { %v273_v16 = vadd.f32 %v272_v14, %v881_v54  ;;  %v274_v17 = vpop.f32.mrb[29].mxu0 }
 0x167   :  { %v275_v18 = vadd.f32 %v274_v17, %v883_v55  ;;  %483 = vmatprep.mubr.f32.mxu1 %v310_v13 }
 0x168   :  { %484 = vmatmul.mubr.f32.gmra.mrb[26].mxu1 %v309_v15  ;;  %v311_v21 = vmax.f32 %v273_v16, 0.0 }
 0x169   :  { %v312_v19 = vmax.f32 %v275_v18, 0.0  ;;  %v278_v20 = vpop.f32.mrb[30].mxu0 }
 0x16a   :  { %v279_v22 = vadd.f32 %v278_v20, %v881_v54  ;;  %v280_v23 = vpop.f32.mrb[31].mxu0 }
 0x16b   :  { %v281_v24 = vadd.f32 %v280_v23, %v883_v55  ;;  %488 = vmatprep.mubr.f32.mxu1 %v312_v19 }
 0x16c   :  { %489 = vmatmul.mubr.f32.gmra.mrb[28].mxu1 %v311_v21  ;;  %v313_v26 = vmax.f32 %v279_v22, 0.0 }
 0x16d   :  { %v314_v25 = vmax.f32 %v281_v24, 0.0 }
 0x16f   :  { %493 = vmatprep.mubr.f32.mxu1 %v314_v25 }
 0x170   :  { %494 = vmatmul.mubr.f32.gmra.mrb[30].mxu1 %v313_v26 }
 0x207   :  { %v566_v27 = vpop.f32.mrb[0].mxu1 }
 0x208   :  { %v567_v29 = vpop.f32.mrb[1].mxu1 }
 0x209   :  { %v568_v30 = vadd.f32 %v567_v29, %v566_v27 }
 0x20b   :  { %v421_v31 = vadd.f32 %v568_v30, %v920_v28  ;;  %v569_v54 = vpop.f32.mrb[2].mxu1 }
 0x20c   :  { %v570_v32 = vpop.f32.mrb[3].mxu1 }
 0x20d   :  { %499 = vst [vmem:[#allocation8] sm:$0xff] %v421_v31  ;;  %v571_v55 = vadd.f32 %v570_v32, %v569_v54 }
 0x20f   :  { %v426_v33 = vadd.f32 %v571_v55, %v920_v28  ;;  %v572_v34 = vpop.f32.mrb[4].mxu1 }
 0x210   :  { %v573_v35 = vpop.f32.mrb[5].mxu1 }
 0x211   :  { %500 = vst [vmem:[#allocation8 + $0x8] sm:$0xff] %v426_v33  ;;  %v574_v36 = vadd.f32 %v573_v35, %v572_v34 }
 0x213   :  { %v431_v37 = vadd.f32 %v574_v36, %v920_v28  ;;  %v575_v38 = vpop.f32.mrb[6].mxu1 }
 0x214   :  { %v576_v39 = vpop.f32.mrb[7].mxu1 }
 0x215   :  { %501 = vst [vmem:[#allocation8 + $0x10] sm:$0xff] %v431_v37  ;;  %v577_v40 = vadd.f32 %v576_v39, %v575_v38 }
 0x217   :  { %v436_v41 = vadd.f32 %v577_v40, %v920_v28  ;;  %v578_v42 = vpop.f32.mrb[8].mxu1 }
 0x218   :  { %v579_v43 = vpop.f32.mrb[9].mxu1 }
 0x219   :  { %502 = vst [vmem:[#allocation8 + $0x18] sm:$0xff] %v436_v41  ;;  %v580_v44 = vadd.f32 %v579_v43, %v578_v42 }
 0x21b   :  { %v441_v45 = vadd.f32 %v580_v44, %v920_v28  ;;  %v581_v46 = vpop.f32.mrb[10].mxu1 }
 0x21c   :  { %v582_v47 = vpop.f32.mrb[11].mxu1 }
 0x21d   :  { %503 = vst [vmem:[#allocation8 + $0x20] sm:$0xff] %v441_v45  ;;  %v583_v48 = vadd.f32 %v582_v47, %v581_v46 }
 0x21f   :  { %v446_v49 = vadd.f32 %v583_v48, %v920_v28  ;;  %v584_v50 = vpop.f32.mrb[12].mxu1 }
 0x220   :  { %v585_v51 = vpop.f32.mrb[13].mxu1 }
 0x221   :  { %504 = vst [vmem:[#allocation8 + $0x28] sm:$0xff] %v446_v49  ;;  %v586_v52 = vadd.f32 %v585_v51, %v584_v50 }
 0x223   :  { %v451_v0 = vadd.f32 %v586_v52, %v920_v28  ;;  %v587_v53 = vpop.f32.mrb[14].mxu1 }
 0x224   :  { %v588_v56 = vpop.f32.mrb[15].mxu1 }
 0x225   :  { %505 = vst [vmem:[#allocation8 + $0x30] sm:$0xff] %v451_v0  ;;  %v589_v57 = vadd.f32 %v588_v56, %v587_v53 }
 0x227   :  { %v456_v58 = vadd.f32 %v589_v57, %v920_v28  ;;  %v590_v59 = vpop.f32.mrb[16].mxu1 }
 0x228   :  { %v591_v60 = vpop.f32.mrb[17].mxu1 }
 0x229   :  { %506 = vst [vmem:[#allocation8 + $0x38] sm:$0xff] %v456_v58  ;;  %v592_v61 = vadd.f32 %v591_v60, %v590_v59 }
 0x22b   :  { %v461_v62 = vadd.f32 %v592_v61, %v920_v28  ;;  %v593_v63 = vpop.f32.mrb[18].mxu1 }
 0x22c   :  { %v594_v1 = vpop.f32.mrb[19].mxu1 }
 0x22d   :  { %507 = vst [vmem:[#allocation8 + $0x40] sm:$0xff] %v461_v62  ;;  %v595_v2 = vadd.f32 %v594_v1, %v593_v63 }
 0x22f   :  { %v466_v3 = vadd.f32 %v595_v2, %v920_v28  ;;  %v596_v4 = vpop.f32.mrb[20].mxu1 }
 0x230   :  { %v597_v5 = vpop.f32.mrb[21].mxu1 }
 0x231   :  { %508 = vst [vmem:[#allocation8 + $0x48] sm:$0xff] %v466_v3  ;;  %v598_v6 = vadd.f32 %v597_v5, %v596_v4 }
 0x233   :  { %v471_v7 = vadd.f32 %v598_v6, %v920_v28  ;;  %v599_v8 = vpop.f32.mrb[22].mxu1 }
 0x234   :  { %v600_v9 = vpop.f32.mrb[23].mxu1 }
 0x235   :  { %509 = vst [vmem:[#allocation8 + $0x50] sm:$0xff] %v471_v7  ;;  %v601_v10 = vadd.f32 %v600_v9, %v599_v8 }
 0x237   :  { %v476_v11 = vadd.f32 %v601_v10, %v920_v28  ;;  %v602_v12 = vpop.f32.mrb[24].mxu1 }
 0x238   :  { %v603_v13 = vpop.f32.mrb[25].mxu1 }
 0x239   :  { %510 = vst [vmem:[#allocation8 + $0x58] sm:$0xff] %v476_v11  ;;  %v604_v14 = vadd.f32 %v603_v13, %v602_v12 }
 0x23b   :  { %v481_v15 = vadd.f32 %v604_v14, %v920_v28  ;;  %v605_v16 = vpop.f32.mrb[26].mxu1 }
 0x23c   :  { %v606_v17 = vpop.f32.mrb[27].mxu1 }
 0x23d   :  { %511 = vst [vmem:[#allocation8 + $0x60] sm:$0xff] %v481_v15  ;;  %v607_v18 = vadd.f32 %v606_v17, %v605_v16 }
 0x23f   :  { %v486_v19 = vadd.f32 %v607_v18, %v920_v28  ;;  %v608_v20 = vpop.f32.mrb[28].mxu1 }
 0x240   :  { %v609_v21 = vpop.f32.mrb[29].mxu1 }
 0x241   :  { %512 = vst [vmem:[#allocation8 + $0x68] sm:$0xff] %v486_v19  ;;  %v610_v22 = vadd.f32 %v609_v21, %v608_v20 }
 0x243   :  { %v491_v23 = vadd.f32 %v610_v22, %v920_v28  ;;  %v611_v24 = vpop.f32.mrb[30].mxu1 }
 0x244   :  { %v612_v25 = vpop.f32.mrb[31].mxu1 }
 0x245   :  { %513 = vst [vmem:[#allocation8 + $0x70] sm:$0xff] %v491_v23  ;;  %v613_v26 = vadd.f32 %v612_v25, %v611_v24 }
 0x247   :  { %v496_v27 = vadd.f32 %v613_v26, %v920_v28 }
 0x249   :  { %514 = vst [vmem:[#allocation8 + $0x78] sm:$0xff] %v496_v27 }
 0x24a   :  { %764 = shalt.err (!%p761_p0)
}
 0x24b   :  { %s765_s12 = scalar_lea.hbm %s958_s5, 2048 }
 0x24c   :  { %p766_p1 = scmp.ne.s32.totalorder %s958_s5, %s765_s12  ;;  %p769_p2 = scmp.lt.u32.totalorder %s765_s12, %s958_s5 }
 0x24e   :  { %p771_p3 = pnand %p769_p2, %p766_p1 }
 0x250   :  { %774 = shalt.err (!%p771_p3)
}
 0x251   :  { %526 = dma.vmem_to_hbm [thread:$0]  %s521_s8, 2048, %s958_s5, [#allocation4], %s785_s1, %s785_s1, %s786_s17  }
 0x252   :  { %779 = dma.done.wait [#allocation4], 2048  }
 0x253   :  { %780 = vsyncadd [#allocation4], 4294965248 }
 0x254   :  { %530 = vsyncpa [#allocation3], 1 }
 0x255   :  { %531 = vsyncpa [#allocation6], 1 }
 0x256   :  { %532 = vsyncpa [#allocation4], 1 }

</bundles_post_ra>
